<compile_context>
chip_gen: v5e
topology: v5e:2x2
jax: 0.10.0
libtpu: 0.0.40
codegen_flags: <defaults>
</compile_context>

<pallas_src>
import jax
import jax.numpy as jnp
import numpy as np
from jax import lax
from jax.experimental import pallas as pl
from jax.experimental.pallas import tpu as pltpu

GROUPS = 32          # GroupNorm32
EPS = 1e-5           # nn.GroupNorm default eps


def _silu(v):
    return v * jax.nn.sigmoid(v)


def _group_sum_bcast(v, groups, cg):
    """Per-group sums of a (1, C) vector, broadcast back to (1, C)."""
    if cg == 1:                      # one channel per group (e.g. C == 32): identity
        return v
    C = groups * cg
    g = jnp.sum(v.reshape(1, groups, cg), axis=-1, keepdims=True)     # (1, G, 1)
    return jnp.broadcast_to(g, (1, groups, cg)).reshape(1, C)


def _group_norm(h2, gamma, beta, groups):
    """GroupNorm over a (H*W, C) float32 tile. gamma/beta: (1, C)."""
    HW, C = h2.shape
    cg = C // groups
    cnt = float(HW * cg)
    sum_c = jnp.sum(h2, axis=0, keepdims=True)                        # (1, C)
    mean_c = _group_sum_bcast(sum_c, groups, cg) / cnt                # (1, C)
    d = h2 - mean_c                                                   # centered
    ss_c = jnp.sum(d * d, axis=0, keepdims=True)                      # (1, C)
    var_c = _group_sum_bcast(ss_c, groups, cg) / cnt                  # (1, C)
    return d * lax.rsqrt(var_c + EPS) * gamma + beta


def _build_hx(a2, W):
    """(H*W, C) f32 activation -> (H*W, 3*C) bf16 kx-tap matrix.

    Columns are [x-1 tap, center, x+1 tap] per channel block, matching kx order
    of an HWIO conv-weight row. Border taps are zeroed (SAME zero padding).
    The +-1 shifts use pltpu.roll on the flattened sublane axis (XLU slot) plus
    an iota border mask; rolls/masks stay f32 (safe sublane rotate), the cast to
    bf16 happens at the concat so the big copy is half-width.
    """
    HW, C = a2.shape
    r = lax.broadcasted_iota(jnp.int32, (HW, 1), 0)          # flat row index y*W + x
    xm = pltpu.roll(a2, shift=1, axis=0)                     # reads (y, x-1), wraps
    xm = jnp.where(r % W == 0, 0.0, xm)                      # zero the x == 0 border
    xp = pltpu.roll(a2, shift=HW - 1, axis=0)                # reads (y, x+1), wraps
    xp = jnp.where(r % W == W - 1, 0.0, xp)                  # zero the x == W-1 border
    return jnp.concatenate([xm.astype(jnp.bfloat16),
                            a2.astype(jnp.bfloat16),
                            xp.astype(jnp.bfloat16)], axis=1)          # (HW, 3C) bf16


def _conv3x3(a2, H, W, w3_ref, bias):
    """3x3 SAME conv of a (H*W, C) f32 activation -> (H*W, Co) f32.

    w3_ref: (3, 3*C, Co) bf16 ref; slice k multiplies the input row y + (k-1).
    Three MXU matmuls (HW, 3C) @ (3C, Co) with f32 accumulation; the ky = +-1
    operands are whole-(W, 3C)-tile axis-0 shifts of hx (zero-padded borders).
    """
    HW, C = a2.shape
    K = 3 * C
    hx = _build_hx(a2, W)                                              # (HW, 3C) bf16
    acc = jnp.dot(hx, w3_ref[1], preferred_element_type=jnp.float32)   # ky = 0 (center)

    hx3 = hx.reshape(H, W, K)                                          # free (leading split)
    zr = jnp.zeros((1, W, K), jnp.bfloat16)
    hx_m = jnp.concatenate([zr, hx3[:H - 1]], axis=0).reshape(HW, K)   # input row y-1
    acc += jnp.dot(hx_m, w3_ref[0], preferred_element_type=jnp.float32)
    hx_p = jnp.concatenate([hx3[1:], zr], axis=0).reshape(HW, K)       # input row y+1
    acc += jnp.dot(hx_p, w3_ref[2], preferred_element_type=jnp.float32)
    return acc + bias


def resblock_kernel(x_ref, eo_ref,
                    gn1_g_ref, gn1_b_ref, w1_ref, b1_ref,
                    gn2_g_ref, gn2_b_ref, w2_ref, b2_ref,
                    o_ref):
    H, W, C = x_ref.shape[1], x_ref.shape[2], x_ref.shape[3]
    Co = o_ref.shape[3]
    HW = H * W

    # ---- in_layers: GroupNorm32 -> SiLU -> Conv3x3(pad=1) -----------------
    x2 = x_ref[0].reshape(HW, C).astype(jnp.float32)
    h2 = _silu(_group_norm(x2, gn1_g_ref[...], gn1_b_ref[...], GROUPS))
    h2 = _conv3x3(h2, H, W, w1_ref, b1_ref[...])                      # (HW, Co) f32

    # ---- emb_layers: precomputed eo = Linear(SiLU(emb)) in the wrapper ----
    h2 = h2 + eo_ref[0].astype(jnp.float32)                           # (1, Co) bcast

    # ---- out_layers: GroupNorm32 -> SiLU -> Dropout -> Conv3x3(pad=1) -----
    # TODO(synk): dropout is identity (inference mode); training-mode dropout
    # would use pltpu.prng_seed / pltpu.prng_random_bits masking.
    h2 = _silu(_group_norm(h2, gn2_g_ref[...], gn2_b_ref[...], GROUPS))
    h2 = _conv3x3(h2, H, W, w2_ref, b2_ref[...])                      # (HW, Co) f32

    # ---- residual: skip_connection is Identity (out_channel == channels) ---
    out2 = x_ref[0].reshape(HW, C).astype(jnp.float32) + h2
    o_ref[0] = out2.reshape(H, W, Co).astype(o_ref.dtype)


def _vmem_budget_bytes(H, W, C, Co):
    """VMEM limit from actual buffer math; capped v7x-safe (64 MiB physical)."""
    HW = H * W
    Cm = max(C, Co)
    act_blocks = 2 * HW * (C + Co) * 4                 # double-buffered x / out blocks (f32)
    weights = (9 * C * Co + 9 * Co * Co) * 2           # single-buffered bf16 conv weights
    transients = 3 * HW * 3 * Cm * 2 + 3 * HW * Cm * 4  # hx (+2 shifts) bf16, f32 act/acc/GN
    need = act_blocks + weights + transients + (4 << 20)
    # v5e/v6e (128 MiB physical) could go higher for huge feature maps; 48 MiB keeps
    # headroom for compiler scratch inside v7x's 64 MiB.
    return int(max(16 << 20, min(need, 48 << 20)))


def resblock_forward(x, emb, params):
    N, H, W, C = x.shape
    E = emb.shape[-1]
    Co = params["b1"].shape[-1]
    assert Co == C, "skip_connection must be Identity (out_channel == channels)"
    # TODO(synk): the 1x1 / 3x3 conv skip branch of the PyTorch ResBlock is not implemented.
    assert C % GROUPS == 0 and Co % GROUPS == 0

    # emb path hoisted out of the kernel: one (N, E) @ (E, Co) XLA matmul instead
    # of an M=1 MXU push per grid step.
    eo = (_silu(emb.astype(jnp.float32)) @ params["lw"] + params["lb"]).reshape(N, 1, Co)

    # Conv weights: HWIO (3, 3, Cin, Co) -> (3, 3*Cin, Co) bf16 (ky-major blocks,
    # each row block ordered (kx, Cin) to match the hx column layout).
    w1 = params["w1"].reshape(3, 3 * C, Co).astype(jnp.bfloat16)
    w2 = params["w2"].reshape(3, 3 * Co, Co).astype(jnp.bfloat16)

    # Grid-invariant params: constant index_map -> single-buffer (double-buffering
    # buys zero DMA overlap, only doubles VMEM residency).
    rep = lambda s: pl.BlockSpec(s, lambda n: (0,) * len(s),
                                 pipeline_mode=pl.Buffered(1))

    grid_spec = pltpu.PrefetchScalarGridSpec(
        num_scalar_prefetch=0,
        # NOTE: on v7x, a grid with >= 2 steps is needed to occupy both TensorCores.
        grid=(N,),
        in_specs=[
            pl.BlockSpec((1, H, W, C), lambda n: (n, 0, 0, 0)),   # x
            pl.BlockSpec((1, 1, Co), lambda n: (n, 0, 0)),        # eo (precomputed emb proj)
            rep((1, C)), rep((1, C)),                             # gn1 gamma/beta
            rep((3, 3 * C, Co)), rep((1, Co)),                    # conv1 w (ky blocks) / b
            rep((1, Co)), rep((1, Co)),                           # gn2 gamma/beta
            rep((3, 3 * Co, Co)), rep((1, Co)),                   # conv2 w (ky blocks) / b
        ],
        out_specs=pl.BlockSpec((1, H, W, Co), lambda n: (n, 0, 0, 0)),
    )

    flops = 2 * N * H * W * (9 * C * Co + 9 * Co * Co)             # the two convs (MXU)
    transcendentals = N * H * W * (C + Co)                         # SiLU sigmoids
    bytes_accessed = (4 * (x.size + N * H * W * Co + N * Co)
                      + 2 * (w1.size + w2.size)
                      + 4 * (2 * C + 4 * Co))
    cost = pl.CostEstimate(flops=int(flops),
                           transcendentals=int(transcendentals),
                           bytes_accessed=int(bytes_accessed))

    return pl.pallas_call(
        resblock_kernel,
        out_shape=jax.ShapeDtypeStruct((N, H, W, Co), x.dtype),
        grid_spec=grid_spec,
        compiler_params=pltpu.CompilerParams(
            dimension_semantics=("parallel",),      # no cross-step carry -> v7x 2-TC sharding
            vmem_limit_bytes=_vmem_budget_bytes(H, W, C, Co),
        ),
        cost_estimate=cost,
    )(x, eo,
      params["gn1_g"], params["gn1_b"], w1, params["b1"],
      params["gn2_g"], params["gn2_b"], w2, params["b2"])


# ---------------------------- pure-JAX reference -----------------------------
def _ref_group_norm(h, gamma, beta, groups):
    N, H, W, C = h.shape
    cg = C // groups
    hg = h.reshape(N, H * W, groups, cg)
    mean = hg.mean(axis=(1, 3), keepdims=True)
    var = ((hg - mean) ** 2).mean(axis=(1, 3), keepdims=True)
    hn = ((hg - mean) / jnp.sqrt(var + EPS)).reshape(N, H, W, C)
    return hn * gamma.reshape(1, 1, 1, C) + beta.reshape(1, 1, 1, C)


def _ref_conv3(h, w, b):
    y = lax.conv_general_dilated(h, w, (1, 1), "SAME",
                                 dimension_numbers=("NHWC", "HWIO", "NHWC"))
    return y + b.reshape(1, 1, 1, -1)


def resblock_reference(x, emb, p):
    h = _ref_conv3(_silu(_ref_group_norm(x, p["gn1_g"], p["gn1_b"], GROUPS)),
                   p["w1"], p["b1"])
    eo = _silu(emb) @ p["lw"] + p["lb"]
    h = h + eo[:, None, None, :]
    h = _silu(_ref_group_norm(h, p["gn2_g"], p["gn2_b"], GROUPS))
    h = _ref_conv3(h, p["w2"], p["b2"])
    return x + h


if __name__ == "__main__":
    N, H, W, C = 2, 8, 8, 32          # channels must be divisible by 32 (GroupNorm32)
    E = 16                            # emb_channels
    Co = C                            # out_channel == channels -> skip is Identity

    key = jax.random.PRNGKey(0)
    ks = jax.random.split(key, 12)
    f32 = jnp.float32
    params = {
        "gn1_g": 1.0 + 0.1 * jax.random.normal(ks[0], (1, C), f32),
        "gn1_b": 0.1 * jax.random.normal(ks[1], (1, C), f32),
        "w1":    0.05 * jax.random.normal(ks[2], (3, 3, C, Co), f32),   # HWIO
        "b1":    0.05 * jax.random.normal(ks[3], (1, Co), f32),
        "lw":    0.05 * jax.random.normal(ks[4], (E, Co), f32),         # Linear weight, pre-transposed
        "lb":    0.05 * jax.random.normal(ks[5], (1, Co), f32),
        "gn2_g": 1.0 + 0.1 * jax.random.normal(ks[6], (1, Co), f32),
        "gn2_b": 0.1 * jax.random.normal(ks[7], (1, Co), f32),
        # NOTE: the PyTorch module wraps this conv in zero_module() at init; we use
        # small random values here so the second-conv path is numerically exercised.
        "w2":    0.05 * jax.random.normal(ks[8], (3, 3, Co, Co), f32),
        "b2":    0.05 * jax.random.normal(ks[9], (1, Co), f32),
    }

    x = jax.random.normal(ks[10], (N, H, W, C), f32)      # NHWC (== NCHW [2,32,8,8])
    emb = jax.random.normal(ks[11], (N, E), f32)

    out = jax.block_until_ready(resblock_forward(x, emb, params))
    ref = jax.block_until_ready(resblock_reference(x, emb, params))

    # Kernel uses bf16 MXU operands (f32 accumulation) vs. an all-f32 reference,
    # so compare with a bf16-appropriate tolerance.
    np.testing.assert_allclose(np.asarray(out), np.asarray(ref), rtol=2e-2, atol=2e-2)
    print("KERNEL_OK")
</pallas_src>

<mosaic_0001>
module attributes {stable_mosaic.version = 11 : i64} {
  func.func @resblock_kernel(%arg0: i32, %arg1: memref<1x8x8x32xf32, #tpu.memory_space<vmem>>, %arg2: memref<1x1x32xf32, #tpu.memory_space<vmem>>, %arg3: memref<1x32xf32, #tpu.memory_space<vmem>>, %arg4: memref<1x32xf32, #tpu.memory_space<vmem>>, %arg5: memref<3x96x32xbf16, #tpu.memory_space<vmem>>, %arg6: memref<1x32xf32, #tpu.memory_space<vmem>>, %arg7: memref<1x32xf32, #tpu.memory_space<vmem>>, %arg8: memref<1x32xf32, #tpu.memory_space<vmem>>, %arg9: memref<3x96x32xbf16, #tpu.memory_space<vmem>>, %arg10: memref<1x32xf32, #tpu.memory_space<vmem>>, %arg11: memref<1x8x8x32xf32, #tpu.memory_space<vmem>>) attributes {dimension_semantics = [#tpu.dimension_semantics<parallel>], iteration_bounds = array<i64: 2>, scalar_prefetch = 0 : i64, scratch_operands = 0 : i64, tpu.core_type = #tpu.core_type<tc>, window_params = [{transform_indices = @transform_0, window_bounds = array<i64: 1, 8, 8, 32>}, {transform_indices = @transform_1, window_bounds = array<i64: 1, 1, 32>}, {pipeline_mode = #tpu.pipeline_mode<synchronous>, transform_indices = @transform_2, window_bounds = array<i64: 1, 32>}, {pipeline_mode = #tpu.pipeline_mode<synchronous>, transform_indices = @transform_3, window_bounds = array<i64: 1, 32>}, {pipeline_mode = #tpu.pipeline_mode<synchronous>, transform_indices = @transform_4, window_bounds = array<i64: 3, 96, 32>}, {pipeline_mode = #tpu.pipeline_mode<synchronous>, transform_indices = @transform_5, window_bounds = array<i64: 1, 32>}, {pipeline_mode = #tpu.pipeline_mode<synchronous>, transform_indices = @transform_6, window_bounds = array<i64: 1, 32>}, {pipeline_mode = #tpu.pipeline_mode<synchronous>, transform_indices = @transform_7, window_bounds = array<i64: 1, 32>}, {pipeline_mode = #tpu.pipeline_mode<synchronous>, transform_indices = @transform_8, window_bounds = array<i64: 3, 96, 32>}, {pipeline_mode = #tpu.pipeline_mode<synchronous>, transform_indices = @transform_9, window_bounds = array<i64: 1, 32>}, {transform_indices = @transform_10, window_bounds = array<i64: 1, 8, 8, 32>}]} {
    %c0 = arith.constant 0 : index
    %c0_0 = arith.constant 0 : index
    %c0_1 = arith.constant 0 : index
    %c0_2 = arith.constant 0 : index
    %0 = vector.load %arg1[%c0, %c0_0, %c0_1, %c0_2] : memref<1x8x8x32xf32, #tpu.memory_space<vmem>>, vector<1x8x8x32xf32>
    %1 = vector.shape_cast %0 : vector<1x8x8x32xf32> to vector<8x8x32xf32>
    %2 = vector.shape_cast %1 : vector<8x8x32xf32> to vector<64x32xf32>
    %c0_3 = arith.constant 0 : index
    %c0_4 = arith.constant 0 : index
    %3 = vector.load %arg3[%c0_3, %c0_4] : memref<1x32xf32, #tpu.memory_space<vmem>>, vector<1x32xf32>
    %c0_5 = arith.constant 0 : index
    %c0_6 = arith.constant 0 : index
    %4 = vector.load %arg4[%c0_5, %c0_6] : memref<1x32xf32, #tpu.memory_space<vmem>>, vector<1x32xf32>
    %cst = arith.constant dense<0.000000e+00> : vector<32xf32>
    %5 = vector.multi_reduction <add>, %2, %cst [0] : vector<64x32xf32> to vector<32xf32>
    %6 = vector.shape_cast %5 : vector<32xf32> to vector<1x32xf32>
    %cst_7 = arith.constant 6.400000e+01 : f32
    %7 = vector.broadcast %cst_7 : f32 to vector<1x32xf32>
    %8 = arith.divf %6, %7 : vector<1x32xf32>
    %9 = vector.broadcast %8 : vector<1x32xf32> to vector<64x32xf32>
    %10 = arith.subf %2, %9 : vector<64x32xf32>
    %11 = arith.mulf %10, %10 : vector<64x32xf32>
    %cst_8 = arith.constant dense<0.000000e+00> : vector<32xf32>
    %12 = vector.multi_reduction <add>, %11, %cst_8 [0] : vector<64x32xf32> to vector<32xf32>
    %13 = vector.shape_cast %12 : vector<32xf32> to vector<1x32xf32>
    %cst_9 = arith.constant 6.400000e+01 : f32
    %14 = vector.broadcast %cst_9 : f32 to vector<1x32xf32>
    %15 = arith.divf %13, %14 : vector<1x32xf32>
    %cst_10 = arith.constant 9.99999974E-6 : f32
    %16 = vector.broadcast %cst_10 : f32 to vector<1x32xf32>
    %17 = arith.addf %15, %16 : vector<1x32xf32>
    %18 = math.rsqrt %17 : vector<1x32xf32>
    %19 = vector.broadcast %18 : vector<1x32xf32> to vector<64x32xf32>
    %20 = arith.mulf %10, %19 : vector<64x32xf32>
    %21 = vector.broadcast %3 : vector<1x32xf32> to vector<64x32xf32>
    %22 = arith.mulf %20, %21 : vector<64x32xf32>
    %23 = vector.broadcast %4 : vector<1x32xf32> to vector<64x32xf32>
    %24 = arith.addf %22, %23 : vector<64x32xf32>
    %25 = arith.negf %24 : vector<64x32xf32>
    %26 = math.exp %25 : vector<64x32xf32>
    %cst_11 = arith.constant 1.000000e+00 : f32
    %27 = vector.broadcast %cst_11 : f32 to vector<64x32xf32>
    %28 = arith.addf %27, %26 : vector<64x32xf32>
    %29 = arith.divf %27, %28 : vector<64x32xf32>
    %30 = arith.mulf %24, %29 : vector<64x32xf32>
    %c0_12 = arith.constant 0 : index
    %c0_13 = arith.constant 0 : index
    %31 = vector.load %arg6[%c0_12, %c0_13] : memref<1x32xf32, #tpu.memory_space<vmem>>, vector<1x32xf32>
    %32 = tpu.iota {dimensions = array<i32: 0>} : vector<64x1xi32>
    %c1_i32 = arith.constant 1 : i32
    %33 = tpu.dynamic_rotate %30 by %c1_i32 dim 0 : vector<64x32xf32>, i32 -> vector<64x32xf32>
    %c8_i32 = arith.constant 8 : i32
    %c0_i32 = arith.constant 0 : i32
    %34 = arith.cmpi eq, %c8_i32, %c0_i32 : i32
    %c1_i32_14 = arith.constant 1 : i32
    %35 = arith.select %34, %c1_i32_14, %c8_i32 : i32
    %36 = vector.broadcast %35 : i32 to vector<64x1xi32>
    %37 = arith.remsi %32, %36 : vector<64x1xi32>
    %c0_i32_15 = arith.constant 0 : i32
    %38 = vector.broadcast %c0_i32_15 : i32 to vector<64x1xi32>
    %39 = arith.cmpi ne, %37, %38 : vector<64x1xi32>
    %c0_i32_16 = arith.constant 0 : i32
    %40 = vector.broadcast %c0_i32_16 : i32 to vector<64x1xi32>
    %41 = arith.cmpi slt, %37, %40 : vector<64x1xi32>
    %c0_i32_17 = arith.constant 0 : i32
    %42 = arith.cmpi slt, %35, %c0_i32_17 : i32
    %43 = vector.broadcast %42 : i1 to vector<64x1xi1>
    %44 = vector.broadcast %43 : vector<64x1xi1> to vector<64x1xi1>
    %45 = arith.xori %41, %44 : vector<64x1xi1>
    %46 = arith.andi %45, %39 : vector<64x1xi1>
    %47 = vector.broadcast %35 : i32 to vector<64x1xi32>
    %48 = arith.addi %37, %47 : vector<64x1xi32>
    %49 = arith.select %46, %48, %37 : vector<64x1xi1>, vector<64x1xi32>
    %c0_i32_18 = arith.constant 0 : i32
    %50 = vector.broadcast %c0_i32_18 : i32 to vector<64x1xi32>
    %51 = arith.cmpi eq, %49, %50 : vector<64x1xi32>
    %cst_19 = arith.constant 0.000000e+00 : f32
    %52 = vector.shape_cast %51 : vector<64x1xi1> to vector<64x1xi1>
    %53 = vector.broadcast %52 : vector<64x1xi1> to vector<64x32xi1>
    %54 = vector.broadcast %cst_19 : f32 to vector<64x32xf32>
    %55 = arith.select %53, %54, %33 : vector<64x32xi1>, vector<64x32xf32>
    %c63_i32 = arith.constant 63 : i32
    %56 = tpu.dynamic_rotate %30 by %c63_i32 dim 0 : vector<64x32xf32>, i32 -> vector<64x32xf32>
    %c8_i32_20 = arith.constant 8 : i32
    %c0_i32_21 = arith.constant 0 : i32
    %57 = arith.cmpi eq, %c8_i32_20, %c0_i32_21 : i32
    %c1_i32_22 = arith.constant 1 : i32
    %58 = arith.select %57, %c1_i32_22, %c8_i32_20 : i32
    %59 = vector.broadcast %58 : i32 to vector<64x1xi32>
    %60 = arith.remsi %32, %59 : vector<64x1xi32>
    %c0_i32_23 = arith.constant 0 : i32
    %61 = vector.broadcast %c0_i32_23 : i32 to vector<64x1xi32>
    %62 = arith.cmpi ne, %60, %61 : vector<64x1xi32>
    %c0_i32_24 = arith.constant 0 : i32
    %63 = vector.broadcast %c0_i32_24 : i32 to vector<64x1xi32>
    %64 = arith.cmpi slt, %60, %63 : vector<64x1xi32>
    %c0_i32_25 = arith.constant 0 : i32
    %65 = arith.cmpi slt, %58, %c0_i32_25 : i32
    %66 = vector.broadcast %65 : i1 to vector<64x1xi1>
    %67 = vector.broadcast %66 : vector<64x1xi1> to vector<64x1xi1>
    %68 = arith.xori %64, %67 : vector<64x1xi1>
    %69 = arith.andi %68, %62 : vector<64x1xi1>
    %70 = vector.broadcast %58 : i32 to vector<64x1xi32>
    %71 = arith.addi %60, %70 : vector<64x1xi32>
    %72 = arith.select %69, %71, %60 : vector<64x1xi1>, vector<64x1xi32>
    %c7_i32 = arith.constant 7 : i32
    %73 = vector.broadcast %c7_i32 : i32 to vector<64x1xi32>
    %74 = arith.cmpi eq, %72, %73 : vector<64x1xi32>
    %cst_26 = arith.constant 0.000000e+00 : f32
    %75 = vector.shape_cast %74 : vector<64x1xi1> to vector<64x1xi1>
    %76 = vector.broadcast %75 : vector<64x1xi1> to vector<64x32xi1>
    %77 = vector.broadcast %cst_26 : f32 to vector<64x32xf32>
    %78 = arith.select %76, %77, %56 : vector<64x32xi1>, vector<64x32xf32>
    %79 = arith.truncf %55 : vector<64x32xf32> to vector<64x32xbf16>
    %80 = arith.truncf %30 : vector<64x32xf32> to vector<64x32xbf16>
    %81 = arith.truncf %78 : vector<64x32xf32> to vector<64x32xbf16>
    %82 = tpu.concatenate %79, %80, %81 in 1 : vector<64x32xbf16>, vector<64x32xbf16>, vector<64x32xbf16> -> vector<64x96xbf16>
    %c1 = arith.constant 1 : index
    %c0_27 = arith.constant 0 : index
    %c0_28 = arith.constant 0 : index
    %83 = vector.load %arg5[%c1, %c0_27, %c0_28] : memref<3x96x32xbf16, #tpu.memory_space<vmem>>, vector<1x96x32xbf16>
    %84 = vector.shape_cast %83 : vector<1x96x32xbf16> to vector<96x32xbf16>
    %cst_29 = arith.constant dense<0.000000e+00> : vector<64x32xf32>
    %85 = tpu.matmul %82, %84, %cst_29 {dimension_numbers = #tpu.dot_dimension_numbers<[1], [0], [0], [1], [0, 0, 1, 1], [], []>} : vector<64x96xbf16>, vector<96x32xbf16>, vector<64x32xf32> -> vector<64x32xf32>
    %86 = vector.shape_cast %82 : vector<64x96xbf16> to vector<8x8x96xbf16>
    %cst_30 = arith.constant 0.000000e+00 : bf16
    %87 = vector.broadcast %cst_30 : bf16 to vector<1x8x96xbf16>
    %88 = vector.extract_strided_slice %86 {offsets = [0, 0, 0], sizes = [7, 8, 96], strides = [1, 1, 1]} : vector<8x8x96xbf16> to vector<7x8x96xbf16>
    %89 = tpu.concatenate %87, %88 in 0 : vector<1x8x96xbf16>, vector<7x8x96xbf16> -> vector<8x8x96xbf16>
    %90 = vector.shape_cast %89 : vector<8x8x96xbf16> to vector<64x96xbf16>
    %c0_31 = arith.constant 0 : index
    %c0_32 = arith.constant 0 : index
    %c0_33 = arith.constant 0 : index
    %91 = vector.load %arg5[%c0_31, %c0_32, %c0_33] : memref<3x96x32xbf16, #tpu.memory_space<vmem>>, vector<1x96x32xbf16>
    %92 = vector.shape_cast %91 : vector<1x96x32xbf16> to vector<96x32xbf16>
    %cst_34 = arith.constant dense<0.000000e+00> : vector<64x32xf32>
    %93 = tpu.matmul %90, %92, %cst_34 {dimension_numbers = #tpu.dot_dimension_numbers<[1], [0], [0], [1], [0, 0, 1, 1], [], []>} : vector<64x96xbf16>, vector<96x32xbf16>, vector<64x32xf32> -> vector<64x32xf32>
    %94 = arith.addf %85, %93 : vector<64x32xf32>
    %95 = vector.extract_strided_slice %86 {offsets = [1, 0, 0], sizes = [7, 8, 96], strides = [1, 1, 1]} : vector<8x8x96xbf16> to vector<7x8x96xbf16>
    %96 = tpu.concatenate %95, %87 in 0 : vector<7x8x96xbf16>, vector<1x8x96xbf16> -> vector<8x8x96xbf16>
    %97 = vector.shape_cast %96 : vector<8x8x96xbf16> to vector<64x96xbf16>
    %c2 = arith.constant 2 : index
    %c0_35 = arith.constant 0 : index
    %c0_36 = arith.constant 0 : index
    %98 = vector.load %arg5[%c2, %c0_35, %c0_36] : memref<3x96x32xbf16, #tpu.memory_space<vmem>>, vector<1x96x32xbf16>
    %99 = vector.shape_cast %98 : vector<1x96x32xbf16> to vector<96x32xbf16>
    %cst_37 = arith.constant dense<0.000000e+00> : vector<64x32xf32>
    %100 = tpu.matmul %97, %99, %cst_37 {dimension_numbers = #tpu.dot_dimension_numbers<[1], [0], [0], [1], [0, 0, 1, 1], [], []>} : vector<64x96xbf16>, vector<96x32xbf16>, vector<64x32xf32> -> vector<64x32xf32>
    %101 = arith.addf %94, %100 : vector<64x32xf32>
    %102 = vector.broadcast %31 : vector<1x32xf32> to vector<64x32xf32>
    %103 = arith.addf %101, %102 : vector<64x32xf32>
    %c0_38 = arith.constant 0 : index
    %c0_39 = arith.constant 0 : index
    %c0_40 = arith.constant 0 : index
    %104 = vector.load %arg2[%c0_38, %c0_39, %c0_40] : memref<1x1x32xf32, #tpu.memory_space<vmem>>, vector<1x1x32xf32>
    %105 = vector.shape_cast %104 : vector<1x1x32xf32> to vector<1x32xf32>
    %106 = vector.broadcast %105 : vector<1x32xf32> to vector<64x32xf32>
    %107 = arith.addf %103, %106 : vector<64x32xf32>
    %c0_41 = arith.constant 0 : index
    %c0_42 = arith.constant 0 : index
    %108 = vector.load %arg7[%c0_41, %c0_42] : memref<1x32xf32, #tpu.memory_space<vmem>>, vector<1x32xf32>
    %c0_43 = arith.constant 0 : index
    %c0_44 = arith.constant 0 : index
    %109 = vector.load %arg8[%c0_43, %c0_44] : memref<1x32xf32, #tpu.memory_space<vmem>>, vector<1x32xf32>
    %cst_45 = arith.constant dense<0.000000e+00> : vector<32xf32>
    %110 = vector.multi_reduction <add>, %107, %cst_45 [0] : vector<64x32xf32> to vector<32xf32>
    %111 = vector.shape_cast %110 : vector<32xf32> to vector<1x32xf32>
    %cst_46 = arith.constant 6.400000e+01 : f32
    %112 = vector.broadcast %cst_46 : f32 to vector<1x32xf32>
    %113 = arith.divf %111, %112 : vector<1x32xf32>
    %114 = vector.broadcast %113 : vector<1x32xf32> to vector<64x32xf32>
    %115 = arith.subf %107, %114 : vector<64x32xf32>
    %116 = arith.mulf %115, %115 : vector<64x32xf32>
    %cst_47 = arith.constant dense<0.000000e+00> : vector<32xf32>
    %117 = vector.multi_reduction <add>, %116, %cst_47 [0] : vector<64x32xf32> to vector<32xf32>
    %118 = vector.shape_cast %117 : vector<32xf32> to vector<1x32xf32>
    %cst_48 = arith.constant 6.400000e+01 : f32
    %119 = vector.broadcast %cst_48 : f32 to vector<1x32xf32>
    %120 = arith.divf %118, %119 : vector<1x32xf32>
    %cst_49 = arith.constant 9.99999974E-6 : f32
    %121 = vector.broadcast %cst_49 : f32 to vector<1x32xf32>
    %122 = arith.addf %120, %121 : vector<1x32xf32>
    %123 = math.rsqrt %122 : vector<1x32xf32>
    %124 = vector.broadcast %123 : vector<1x32xf32> to vector<64x32xf32>
    %125 = arith.mulf %115, %124 : vector<64x32xf32>
    %126 = vector.broadcast %108 : vector<1x32xf32> to vector<64x32xf32>
    %127 = arith.mulf %125, %126 : vector<64x32xf32>
    %128 = vector.broadcast %109 : vector<1x32xf32> to vector<64x32xf32>
    %129 = arith.addf %127, %128 : vector<64x32xf32>
    %130 = arith.negf %129 : vector<64x32xf32>
    %131 = math.exp %130 : vector<64x32xf32>
    %cst_50 = arith.constant 1.000000e+00 : f32
    %132 = vector.broadcast %cst_50 : f32 to vector<64x32xf32>
    %133 = arith.addf %132, %131 : vector<64x32xf32>
    %134 = arith.divf %132, %133 : vector<64x32xf32>
    %135 = arith.mulf %129, %134 : vector<64x32xf32>
    %c0_51 = arith.constant 0 : index
    %c0_52 = arith.constant 0 : index
    %136 = vector.load %arg10[%c0_51, %c0_52] : memref<1x32xf32, #tpu.memory_space<vmem>>, vector<1x32xf32>
    %137 = tpu.iota {dimensions = array<i32: 0>} : vector<64x1xi32>
    %c1_i32_53 = arith.constant 1 : i32
    %138 = tpu.dynamic_rotate %135 by %c1_i32_53 dim 0 : vector<64x32xf32>, i32 -> vector<64x32xf32>
    %c8_i32_54 = arith.constant 8 : i32
    %c0_i32_55 = arith.constant 0 : i32
    %139 = arith.cmpi eq, %c8_i32_54, %c0_i32_55 : i32
    %c1_i32_56 = arith.constant 1 : i32
    %140 = arith.select %139, %c1_i32_56, %c8_i32_54 : i32
    %141 = vector.broadcast %140 : i32 to vector<64x1xi32>
    %142 = arith.remsi %137, %141 : vector<64x1xi32>
    %c0_i32_57 = arith.constant 0 : i32
    %143 = vector.broadcast %c0_i32_57 : i32 to vector<64x1xi32>
    %144 = arith.cmpi ne, %142, %143 : vector<64x1xi32>
    %c0_i32_58 = arith.constant 0 : i32
    %145 = vector.broadcast %c0_i32_58 : i32 to vector<64x1xi32>
    %146 = arith.cmpi slt, %142, %145 : vector<64x1xi32>
    %c0_i32_59 = arith.constant 0 : i32
    %147 = arith.cmpi slt, %140, %c0_i32_59 : i32
    %148 = vector.broadcast %147 : i1 to vector<64x1xi1>
    %149 = vector.broadcast %148 : vector<64x1xi1> to vector<64x1xi1>
    %150 = arith.xori %146, %149 : vector<64x1xi1>
    %151 = arith.andi %150, %144 : vector<64x1xi1>
    %152 = vector.broadcast %140 : i32 to vector<64x1xi32>
    %153 = arith.addi %142, %152 : vector<64x1xi32>
    %154 = arith.select %151, %153, %142 : vector<64x1xi1>, vector<64x1xi32>
    %c0_i32_60 = arith.constant 0 : i32
    %155 = vector.broadcast %c0_i32_60 : i32 to vector<64x1xi32>
    %156 = arith.cmpi eq, %154, %155 : vector<64x1xi32>
    %cst_61 = arith.constant 0.000000e+00 : f32
    %157 = vector.shape_cast %156 : vector<64x1xi1> to vector<64x1xi1>
    %158 = vector.broadcast %157 : vector<64x1xi1> to vector<64x32xi1>
    %159 = vector.broadcast %cst_61 : f32 to vector<64x32xf32>
    %160 = arith.select %158, %159, %138 : vector<64x32xi1>, vector<64x32xf32>
    %c63_i32_62 = arith.constant 63 : i32
    %161 = tpu.dynamic_rotate %135 by %c63_i32_62 dim 0 : vector<64x32xf32>, i32 -> vector<64x32xf32>
    %c8_i32_63 = arith.constant 8 : i32
    %c0_i32_64 = arith.constant 0 : i32
    %162 = arith.cmpi eq, %c8_i32_63, %c0_i32_64 : i32
    %c1_i32_65 = arith.constant 1 : i32
    %163 = arith.select %162, %c1_i32_65, %c8_i32_63 : i32
    %164 = vector.broadcast %163 : i32 to vector<64x1xi32>
    %165 = arith.remsi %137, %164 : vector<64x1xi32>
    %c0_i32_66 = arith.constant 0 : i32
    %166 = vector.broadcast %c0_i32_66 : i32 to vector<64x1xi32>
    %167 = arith.cmpi ne, %165, %166 : vector<64x1xi32>
    %c0_i32_67 = arith.constant 0 : i32
    %168 = vector.broadcast %c0_i32_67 : i32 to vector<64x1xi32>
    %169 = arith.cmpi slt, %165, %168 : vector<64x1xi32>
    %c0_i32_68 = arith.constant 0 : i32
    %170 = arith.cmpi slt, %163, %c0_i32_68 : i32
    %171 = vector.broadcast %170 : i1 to vector<64x1xi1>
    %172 = vector.broadcast %171 : vector<64x1xi1> to vector<64x1xi1>
    %173 = arith.xori %169, %172 : vector<64x1xi1>
    %174 = arith.andi %173, %167 : vector<64x1xi1>
    %175 = vector.broadcast %163 : i32 to vector<64x1xi32>
    %176 = arith.addi %165, %175 : vector<64x1xi32>
    %177 = arith.select %174, %176, %165 : vector<64x1xi1>, vector<64x1xi32>
    %c7_i32_69 = arith.constant 7 : i32
    %178 = vector.broadcast %c7_i32_69 : i32 to vector<64x1xi32>
    %179 = arith.cmpi eq, %177, %178 : vector<64x1xi32>
    %cst_70 = arith.constant 0.000000e+00 : f32
    %180 = vector.shape_cast %179 : vector<64x1xi1> to vector<64x1xi1>
    %181 = vector.broadcast %180 : vector<64x1xi1> to vector<64x32xi1>
    %182 = vector.broadcast %cst_70 : f32 to vector<64x32xf32>
    %183 = arith.select %181, %182, %161 : vector<64x32xi1>, vector<64x32xf32>
    %184 = arith.truncf %160 : vector<64x32xf32> to vector<64x32xbf16>
    %185 = arith.truncf %135 : vector<64x32xf32> to vector<64x32xbf16>
    %186 = arith.truncf %183 : vector<64x32xf32> to vector<64x32xbf16>
    %187 = tpu.concatenate %184, %185, %186 in 1 : vector<64x32xbf16>, vector<64x32xbf16>, vector<64x32xbf16> -> vector<64x96xbf16>
    %c1_71 = arith.constant 1 : index
    %c0_72 = arith.constant 0 : index
    %c0_73 = arith.constant 0 : index
    %188 = vector.load %arg9[%c1_71, %c0_72, %c0_73] : memref<3x96x32xbf16, #tpu.memory_space<vmem>>, vector<1x96x32xbf16>
    %189 = vector.shape_cast %188 : vector<1x96x32xbf16> to vector<96x32xbf16>
    %cst_74 = arith.constant dense<0.000000e+00> : vector<64x32xf32>
    %190 = tpu.matmul %187, %189, %cst_74 {dimension_numbers = #tpu.dot_dimension_numbers<[1], [0], [0], [1], [0, 0, 1, 1], [], []>} : vector<64x96xbf16>, vector<96x32xbf16>, vector<64x32xf32> -> vector<64x32xf32>
    %191 = vector.shape_cast %187 : vector<64x96xbf16> to vector<8x8x96xbf16>
    %cst_75 = arith.constant 0.000000e+00 : bf16
    %192 = vector.broadcast %cst_75 : bf16 to vector<1x8x96xbf16>
    %193 = vector.extract_strided_slice %191 {offsets = [0, 0, 0], sizes = [7, 8, 96], strides = [1, 1, 1]} : vector<8x8x96xbf16> to vector<7x8x96xbf16>
    %194 = tpu.concatenate %192, %193 in 0 : vector<1x8x96xbf16>, vector<7x8x96xbf16> -> vector<8x8x96xbf16>
    %195 = vector.shape_cast %194 : vector<8x8x96xbf16> to vector<64x96xbf16>
    %c0_76 = arith.constant 0 : index
    %c0_77 = arith.constant 0 : index
    %c0_78 = arith.constant 0 : index
    %196 = vector.load %arg9[%c0_76, %c0_77, %c0_78] : memref<3x96x32xbf16, #tpu.memory_space<vmem>>, vector<1x96x32xbf16>
    %197 = vector.shape_cast %196 : vector<1x96x32xbf16> to vector<96x32xbf16>
    %cst_79 = arith.constant dense<0.000000e+00> : vector<64x32xf32>
    %198 = tpu.matmul %195, %197, %cst_79 {dimension_numbers = #tpu.dot_dimension_numbers<[1], [0], [0], [1], [0, 0, 1, 1], [], []>} : vector<64x96xbf16>, vector<96x32xbf16>, vector<64x32xf32> -> vector<64x32xf32>
    %199 = arith.addf %190, %198 : vector<64x32xf32>
    %200 = vector.extract_strided_slice %191 {offsets = [1, 0, 0], sizes = [7, 8, 96], strides = [1, 1, 1]} : vector<8x8x96xbf16> to vector<7x8x96xbf16>
    %201 = tpu.concatenate %200, %192 in 0 : vector<7x8x96xbf16>, vector<1x8x96xbf16> -> vector<8x8x96xbf16>
    %202 = vector.shape_cast %201 : vector<8x8x96xbf16> to vector<64x96xbf16>
    %c2_80 = arith.constant 2 : index
    %c0_81 = arith.constant 0 : index
    %c0_82 = arith.constant 0 : index
    %203 = vector.load %arg9[%c2_80, %c0_81, %c0_82] : memref<3x96x32xbf16, #tpu.memory_space<vmem>>, vector<1x96x32xbf16>
    %204 = vector.shape_cast %203 : vector<1x96x32xbf16> to vector<96x32xbf16>
    %cst_83 = arith.constant dense<0.000000e+00> : vector<64x32xf32>
    %205 = tpu.matmul %202, %204, %cst_83 {dimension_numbers = #tpu.dot_dimension_numbers<[1], [0], [0], [1], [0, 0, 1, 1], [], []>} : vector<64x96xbf16>, vector<96x32xbf16>, vector<64x32xf32> -> vector<64x32xf32>
    %206 = arith.addf %199, %205 : vector<64x32xf32>
    %207 = vector.broadcast %136 : vector<1x32xf32> to vector<64x32xf32>
    %208 = arith.addf %206, %207 : vector<64x32xf32>
    %c0_84 = arith.constant 0 : index
    %c0_85 = arith.constant 0 : index
    %c0_86 = arith.constant 0 : index
    %c0_87 = arith.constant 0 : index
    %209 = vector.load %arg1[%c0_84, %c0_85, %c0_86, %c0_87] : memref<1x8x8x32xf32, #tpu.memory_space<vmem>>, vector<1x8x8x32xf32>
    %210 = vector.shape_cast %209 : vector<1x8x8x32xf32> to vector<8x8x32xf32>
    %211 = vector.shape_cast %210 : vector<8x8x32xf32> to vector<64x32xf32>
    %212 = arith.addf %211, %208 : vector<64x32xf32>
    %213 = vector.shape_cast %212 : vector<64x32xf32> to vector<8x8x32xf32>
    %c0_88 = arith.constant 0 : index
    %c0_89 = arith.constant 0 : index
    %c0_90 = arith.constant 0 : index
    %c0_91 = arith.constant 0 : index
    %214 = vector.load %arg11[%c0_88, %c0_89, %c0_90, %c0_91] : memref<1x8x8x32xf32, #tpu.memory_space<vmem>>, vector<1x8x8x32xf32>
    %215 = vector.shape_cast %214 : vector<1x8x8x32xf32> to vector<8x8x32xf32>
    %216 = vector.shape_cast %213 : vector<8x8x32xf32> to vector<1x8x8x32xf32>
    tpu.vector_store %arg11[%c0_88, %c0_89, %c0_90, %c0_91], %216 {strides = array<i32>} : memref<1x8x8x32xf32, #tpu.memory_space<vmem>>, vector<1x8x8x32xf32>,
    return
  }
  func.func @transform_0(%arg0: i32) -> (i32, i32, i32, i32) {
    %c0_i32 = arith.constant 0 : i32
    %c0_i32_0 = arith.constant 0 : i32
    %c0_i32_1 = arith.constant 0 : i32
    %c0_i32_2 = arith.constant 0 : i32
    return %arg0, %c0_i32, %c0_i32_0, %c0_i32_1 : i32, i32, i32, i32
  }
  func.func @transform_1(%arg0: i32) -> (i32, i32, i32) {
    %c0_i32 = arith.constant 0 : i32
    %c0_i32_0 = arith.constant 0 : i32
    %c0_i32_1 = arith.constant 0 : i32
    return %arg0, %c0_i32, %c0_i32_0 : i32, i32, i32
  }
  func.func @transform_2(%arg0: i32) -> (i32, i32) {
    %c0_i32 = arith.constant 0 : i32
    %c0_i32_0 = arith.constant 0 : i32
    %c0_i32_1 = arith.constant 0 : i32
    return %c0_i32, %c0_i32_0 : i32, i32
  }
  func.func @transform_3(%arg0: i32) -> (i32, i32) {
    %c0_i32 = arith.constant 0 : i32
    %c0_i32_0 = arith.constant 0 : i32
    %c0_i32_1 = arith.constant 0 : i32
    return %c0_i32, %c0_i32_0 : i32, i32
  }
  func.func @transform_4(%arg0: i32) -> (i32, i32, i32) {
    %c0_i32 = arith.constant 0 : i32
    %c0_i32_0 = arith.constant 0 : i32
    %c0_i32_1 = arith.constant 0 : i32
    %c0_i32_2 = arith.constant 0 : i32
    return %c0_i32, %c0_i32_0, %c0_i32_1 : i32, i32, i32
  }
  func.func @transform_5(%arg0: i32) -> (i32, i32) {
    %c0_i32 = arith.constant 0 : i32
    %c0_i32_0 = arith.constant 0 : i32
    %c0_i32_1 = arith.constant 0 : i32
    return %c0_i32, %c0_i32_0 : i32, i32
  }
  func.func @transform_6(%arg0: i32) -> (i32, i32) {
    %c0_i32 = arith.constant 0 : i32
    %c0_i32_0 = arith.constant 0 : i32
    %c0_i32_1 = arith.constant 0 : i32
    return %c0_i32, %c0_i32_0 : i32, i32
  }
  func.func @transform_7(%arg0: i32) -> (i32, i32) {
    %c0_i32 = arith.constant 0 : i32
    %c0_i32_0 = arith.constant 0 : i32
    %c0_i32_1 = arith.constant 0 : i32
    return %c0_i32, %c0_i32_0 : i32, i32
  }
  func.func @transform_8(%arg0: i32) -> (i32, i32, i32) {
    %c0_i32 = arith.constant 0 : i32
    %c0_i32_0 = arith.constant 0 : i32
    %c0_i32_1 = arith.constant 0 : i32
    %c0_i32_2 = arith.constant 0 : i32
    return %c0_i32, %c0_i32_0, %c0_i32_1 : i32, i32, i32
  }
  func.func @transform_9(%arg0: i32) -> (i32, i32) {
    %c0_i32 = arith.constant 0 : i32
    %c0_i32_0 = arith.constant 0 : i32
    %c0_i32_1 = arith.constant 0 : i32
    return %c0_i32, %c0_i32_0 : i32, i32
  }
  func.func @transform_10(%arg0: i32) -> (i32, i32, i32, i32) {
    %c0_i32 = arith.constant 0 : i32
    %c0_i32_0 = arith.constant 0 : i32
    %c0_i32_1 = arith.constant 0 : i32
    %c0_i32_2 = arith.constant 0 : i32
    return %arg0, %c0_i32, %c0_i32_0, %c0_i32_1 : i32, i32, i32, i32
  }
}

</mosaic_0001>

<bundles_post_ra>
// kernel: tpu_custom_call.1
= control target key start
LH: loop header
LB: loop body
LE: loop exit
PB: predicated region body
PF: predicated region fallthrough
CT: control target
= control target key end

     0   :  { %s3793_s0 = inlined_call_operand.vmem [shape: f32[2,8,8,32], index: 0, kind: input, shape index: {}]   ;;  %s3794_s1 = inlined_call_operand.vmem [shape: f32[2,1,32], index: 1, kind: input, shape index: {}]   ;;  %s3795_s2 = inlined_call_operand.vmem [shape: f32[1,32], index: 2, kind: input, shape index: {}]   ;;  %s3796_s3 = inlined_call_operand.vmem [shape: f32[1,32], index: 3, kind: input, shape index: {}]   ;;  %s3797_s4 = inlined_call_operand.vmem [shape: bf16[3,96,32], index: 4, kind: input, shape index: {}]   ;;  %s3798_s5 = inlined_call_operand.vmem [shape: f32[1,32], index: 5, kind: input, shape index: {}]   ;;  %s3799_s6 = inlined_call_operand.vmem [shape: f32[1,32], index: 6, kind: input, shape index: {}]   ;;  %s3800_s7 = inlined_call_operand.vmem [shape: f32[1,32], index: 7, kind: input, shape index: {}]   ;;  %s3801_s8 = inlined_call_operand.vmem [shape: bf16[3,96,32], index: 8, kind: input, shape index: {}]   ;;  %s3802_s9 = inlined_call_operand.vmem [shape: f32[1,32], index: 9, kind: input, shape index: {}]   ;;  %s3803_s10 = inlined_call_operand.hbm [shape: f32[2,8,8,32], index: 10, kind: output, shape index: {}]  }
   0x1   :  { %3825 = sst [smem:[#allocation6_spill]] %s3793_s0 }
   0x2   :  { %15 = vsyncpa [#allocation3], 0 }
   0x3   :  { %17 = vsyncpa [#allocation3 + $0x1], 0  ;;  %s2660_s13 = smov 0   ;;  %s2662_s14 = smov 0  }
   0x4   :  { %s2664_s15 = smov 0   ;;  %s2666_s16 = smov 0  }
   0x5 LB: > { %s2681_s17 = sadd.s32 4294967295, %s2597_s16   ;;  %s2111_s18 = sadd.s32 4294967294, %s2597_s16   ;;  %s2597_s16 = sphi %s2666_s16, %s3996_s16   ;;  %s2593_s15 = sphi %s2664_s15, %s3995_s15   ;;  %s2589_s14 = sphi %s2662_s14, %s3994_s14   ;;  %s2585_s13 = sphi %s2660_s13, %s3993_s13  }
   0x6   : > { %s2685_s19 = sadd.s32 1, %s2597_s16   ;;  %s250_s20 = sadd.s32 1, %s2593_s15 }
   0x7   : > { %s247_s21 = ssub.s32 %s2597_s16, %s2685_s19  ;;  %p260_p0 = scmp.ne.s32.totalorder %s2593_s15, %s2589_s14 }
   0x8   : > { %p248_p1 = scmp.eq.s32.totalorder %s247_s21, 0  ;;  %p261_p2 = scmp.eq.s32.totalorder %s2681_s17, 1 }
   0x9   : > { %p266_p3 = scmp.ne.s32.totalorder %s2589_s14, %s2585_s13  ;;  %p267_p4 = scmp.eq.s32.totalorder %s2111_s18, 1 }
   0xa   : > { %s2696_s22 = scalar_select %p248_p1, %s2593_s15, %s250_s20  }
   0xb   : > { %p2698_p5 = por %p261_p2, %p260_p0  ;;  %p2702_p6 = por %p267_p4, %p266_p3 }
   0xc   : > { %p2114_p7 = scmp.ge.s32.totalorder %s2597_s16, 1  ;;  %p323_p8 = scmp.lt.s32.totalorder %s2597_s16, 3 }
   0xe   : > { %p324_p9 = pnand %p2114_p7, %p323_p8 }
  0x10   : > { %327 = sbr.rel (%p324_p9) target bundleno = 960 (0x3c0), region = 60 }
  0x15   : > { %p364_p10 = scmp.lt.s32.totalorder %s2681_s17, 1  ;;  %vm3804_vm0 = vcmask 261120   ;;  %s3828_s0 = sld [smem:[#allocation6_spill]]  ;;  %v2599_v3 = vmov 64.0  }
  0x16   : > { %2457 = vrcp.f32 %v2599_v3  ;;  %s2600_s20 = smov 32   ;;  %s3805_s21 = smov 64  }
  0x17   : > { %s2710_s25 = scalar_select %p364_p10, %s2681_s17, 1 }
  0x18   : > { %s361_s11 = sand.u32 1, %s2589_s14   ;;  %s2392_s27 = sshll.u32 %s2681_s17, 6 }
  0x19   : > { %s2355_s26 = sshll.u32 %s2710_s25, 6  ;;  %s2025_s17 = scalar_lea.sflag [#allocation3], %s361_s11 }
  0x1a   : > { %s2555_s30 = scalar_lea.hbm %s3803_s10, 128 }
  0x1b   : > { %s2716_s29 = scalar_lea.vmem %s3828_s0, %s2355_s26  ;;  %s371_s26 = scalar_lea.vmem %s3794_s1, %s2710_s25 }
  0x1c   : > { %v373_v0 = vld [vmem:[%s2716_s29] sm:$0xff]  ;;  %v374_v1 = vld [vmem:[%s2716_s29 + $0x8] sm:$0xff]  ;;  %v375_v2 = vld [vmem:[%s2716_s29 + $0x10] sm:$0xff]  ;;  %v2458_v14 = vpop.eup %2457 }
  0x1d   : > { %v376_v4 = vld [vmem:[%s2716_s29 + $0x18] sm:$0xff]  ;;  %v384_v5 = vsel %vm3804_vm0, %v373_v0, 0.0  ;;  %v385_v6 = vsel %vm3804_vm0, %v374_v1, 0.0  ;;  %v387_v7 = vsel %vm3804_vm0, %v375_v2, 0.0  ;;  %v377_v8 = vld [vmem:[%s2716_s29 + $0x20] sm:$0xff]  ;;  %v378_v11 = vld [vmem:[%s2716_s29 + $0x28] sm:$0xff]  ;;  %vm410_vm1 = vweird.f32 %v2458_v14 }
  0x1e   : > { %v386_v9 = vadd.f32 %v385_v6, %v384_v5  ;;  %v389_v10 = vsel %vm3804_vm0, %v376_v4, 0.0  ;;  %v391_v13 = vsel %vm3804_vm0, %v377_v8, 0.0  ;;  %v379_v15 = vld [vmem:[%s2716_s29 + $0x30] sm:$0xff]  ;;  %v393_v17 = vsel %vm3804_vm0, %v378_v11, 0.0  ;;  %v380_v18 = vld [vmem:[%s2716_s29 + $0x38] sm:$0xff] }
  0x1f   : > { %v395_v20 = vsel %vm3804_vm0, %v379_v15, 0.0  ;;  %v406_v21 = vmul.f32 64.0, %v2458_v14  ;;  %v397_v23 = vsel %vm3804_vm0, %v380_v18, 0.0 }
  0x20   : > { %v388_v12 = vadd.f32 %v387_v7, %v386_v9 }
  0x21   : > { %v407_v25 = vsub.f32 1.0, %v406_v21 }
  0x22   : > { %v390_v16 = vadd.f32 %v389_v10, %v388_v12 }
  0x23   : > { %v408_v28 = vmul.f32 %v2458_v14, %v407_v25 }
  0x24   : > { %v392_v19 = vadd.f32 %v391_v13, %v390_v16 }
  0x25   : > { %v409_v31 = vadd.f32 %v2458_v14, %v408_v28 }
  0x26   : > { %v394_v22 = vadd.f32 %v393_v17, %v392_v19 }
  0x27   : > { %v2734_v34 = vsel %vm410_vm1, %v2458_v14, %v409_v31 }
  0x28   : > { %v396_v24 = vadd.f32 %v395_v20, %v394_v22  ;;  %v2451_v22 = vld [vmem:[%s3796_s3] ss:$0 sm:$0xff] }
  0x2a   : > { %v398_v26 = vadd.f32 %v397_v23, %v396_v24 }
  0x2c   : > { %v399_v27 = vrot.slane %v398_v26, 4 }
  0x2e   : > { %v400_v29 = vadd.f32 %v399_v27, %v398_v26 }
  0x30   : > { %v401_v30 = vrot.slane %v400_v29, 2 }
  0x32   : > { %v402_v32 = vadd.f32 %v401_v30, %v400_v29 }
  0x34   : > { %v403_v33 = vrot.slane %v402_v32, 1 }
  0x36   : > { %v404_v35 = vadd.f32 %v403_v33, %v402_v32 }
  0x38   : > { %v412_v36 = vmul.f32 %v2734_v34, %v404_v35 }
  0x3a   : > { %v413_v37 = vsub.f32 %v373_v0, %v412_v36  ;;  %v414_v38 = vsub.f32 %v374_v1, %v412_v36  ;;  %v415_v39 = vsub.f32 %v375_v2, %v412_v36  ;;  %v416_v40 = vsub.f32 %v376_v4, %v412_v36 }
  0x3b   : > { %v417_v41 = vsub.f32 %v377_v8, %v412_v36  ;;  %v418_v42 = vsub.f32 %v378_v11, %v412_v36  ;;  %v419_v47 = vsub.f32 %v379_v15, %v412_v36  ;;  %v420_v53 = vsub.f32 %v380_v18, %v412_v36  ;;  %v2450_v18 = vld [vmem:[%s3795_s2] ss:$0 sm:$0xff] }
  0x3c   : > { %v421_v43 = vmul.f32 %v413_v37, %v413_v37  ;;  %v422_v44 = vmul.f32 %v414_v38, %v414_v38  ;;  %v423_v45 = vmul.f32 %v415_v39, %v415_v39  ;;  %v424_v46 = vmul.f32 %v416_v40, %v416_v40 }
  0x3d   : > { %v425_v48 = vmul.f32 %v417_v41, %v417_v41  ;;  %v426_v54 = vmul.f32 %v418_v42, %v418_v42  ;;  %v427_v57 = vmul.f32 %v419_v47, %v419_v47  ;;  %v428_v60 = vmul.f32 %v420_v53, %v420_v53 }
  0x3e   : > { %v429_v49 = vsel %vm3804_vm0, %v421_v43, 0.0  ;;  %v430_v50 = vsel %vm3804_vm0, %v422_v44, 0.0  ;;  %v432_v51 = vsel %vm3804_vm0, %v423_v45, 0.0  ;;  %v434_v55 = vsel %vm3804_vm0, %v424_v46, 0.0 }
  0x3f   : > { %v431_v52 = vadd.f32 %v430_v50, %v429_v49  ;;  %v436_v58 = vsel %vm3804_vm0, %v425_v48, 0.0  ;;  %v438_v61 = vsel %vm3804_vm0, %v426_v54, 0.0  ;;  %v440_v63 = vsel %vm3804_vm0, %v427_v57, 0.0 }
  0x40   : > { %v442_v1 = vsel %vm3804_vm0, %v428_v60, 0.0  ;;  %v653_v45 = vlaneseq }
  0x41   : > { %v433_v56 = vadd.f32 %v432_v51, %v431_v52 }
  0x42   : > { %v2771_v51 = vshrl.u32 %v653_v45, 7 }
  0x43   : > { %v435_v59 = vadd.f32 %v434_v55, %v433_v56 }
  0x44   : > { %v2778_v56 = vadd.s32 16, %v2771_v51 }
  0x45   : > { %v437_v62 = vadd.f32 %v436_v58, %v435_v59 }
  0x47   : > { %v439_v0 = vadd.f32 %v438_v61, %v437_v62  ;;  %v2785_v61 = vadd.s32 24, %v2771_v51 }
  0x49   : > { %v441_v2 = vadd.f32 %v440_v63, %v439_v0  ;;  %v2790_v63 = vadd.s32 32, %v2771_v51  ;;  %v2793_v0 = vadd.s32 40, %v2771_v51 }
  0x4b   : > { %v443_v3 = vadd.f32 %v442_v1, %v441_v2 }
  0x4d   : > { %v444_v4 = vrot.slane %v443_v3, 4 }
  0x4f   : > { %v445_v5 = vadd.f32 %v444_v4, %v443_v3  ;;  %v697_v3 = vand.u32 7, %v2778_v56 }
  0x51   : > { %v446_v6 = vrot.slane %v445_v5, 2 }
  0x53   : > { %v447_v7 = vadd.f32 %v446_v6, %v445_v5 }
  0x55   : > { %v448_v8 = vrot.slane %v447_v7, 1 }
  0x57   : > { %v449_v9 = vadd.f32 %v448_v8, %v447_v7 }
  0x59   : > { %v450_v10 = vmul.f32 %v449_v9, %v2734_v34 }
  0x5b   : > { %v451_v11 = vadd.f32 1e-05, %v450_v10  ;;  %v704_v10 = vand.u32 7, %v2785_v61 }
  0x5d   : > { %2459 = vrsqrt.f32 %v451_v11  ;;  %vm458_vm2 = vweird.f32 %v451_v11 }
  0x63   : > { %v2460_v12 = vpop.eup %2459 }
  0x64   : > { %v453_v13 = vmul.f32 %v2460_v12, %v451_v11  ;;  %vm459_vm3 = vweird.f32 %v2460_v12 }
  0x65   : > { %vm460_vm4 = vmor %vm458_vm2, %vm459_vm3  ;;  %vm2862_vm3 = vcmp.eq.s32.totalorder %v697_v3, 7 }
  0x66   : > { %v454_v14 = vmul.f32 %v2460_v12, %v453_v13  ;;  %v711_v13 = vand.u32 7, %v2790_v63  ;;  %v2371_v63 = vld [vmem:[%s3797_s4 + $0x78] sm:$0xff] }
  0x68   : > { %v455_v15 = vmul.f32 0.5, %v454_v14  ;;  %v718_v14 = vand.u32 7, %v2793_v0  ;;  %v3887_v0 = vmov 0 }
  0x6a   : > { %v456_v16 = vsub.f32 1.5, %v455_v15 }
  0x6c   : > { %v457_v17 = vmul.f32 %v2460_v12, %v456_v16 }
  0x6e   : > { %v461_v19 = vsel %vm460_vm4, %v2460_v12, %v457_v17 }
  0x6f   : > { %v464_v20 = vmul.f32 %v461_v19, %v415_v39  ;;  %v465_v21 = vmul.f32 %v461_v19, %v416_v40  ;;  %v466_v23 = vmul.f32 %v461_v19, %v417_v41  ;;  %v467_v24 = vmul.f32 %v461_v19, %v418_v42 }
  0x70   : > { %v468_v25 = vmul.f32 %v461_v19, %v419_v47  ;;  %v462_v26 = vmul.f32 %v461_v19, %v413_v37  ;;  %v463_v27 = vmul.f32 %v461_v19, %v414_v38  ;;  %v469_v35 = vmul.f32 %v461_v19, %v420_v53 }
  0x71   : > { %v475_v28 = vmul.f32 %v2450_v18, %v464_v20  ;;  %v476_v29 = vmul.f32 %v2450_v18, %v465_v21  ;;  %v477_v30 = vmul.f32 %v2450_v18, %v466_v23  ;;  %v478_v31 = vmul.f32 %v2450_v18, %v467_v24 }
  0x72   : > { %v479_v32 = vmul.f32 %v2450_v18, %v468_v25  ;;  %v473_v33 = vmul.f32 %v2450_v18, %v462_v26  ;;  %v474_v43 = vmul.f32 %v2450_v18, %v463_v27  ;;  %v480_v49 = vmul.f32 %v2450_v18, %v469_v35 }
  0x73   : > { %v2752_v36 = vadd.f32 %v2451_v22, %v475_v28  ;;  %v2754_v39 = vadd.f32 %v2451_v22, %v476_v29  ;;  %v2756_v40 = vadd.f32 %v2451_v22, %v477_v30  ;;  %v2758_v44 = vadd.f32 %v2451_v22, %v478_v31 }
  0x74   : > { %v2760_v41 = vadd.f32 %v2451_v22, %v479_v32  ;;  %v2765_v46 = vadd.f32 %v2451_v22, %v473_v33  ;;  %v2768_v48 = vadd.f32 %v2451_v22, %v474_v43  ;;  %v2775_v54 = vadd.f32 %v2451_v22, %v480_v49 }
  0x75   : > { %v2120_v37 = vmul.f32 -1.442695, %v2752_v36  ;;  %v2121_v38 = vmul.f32 -1.442695, %v2754_v39  ;;  %v2122_v42 = vmul.f32 -1.442695, %v2756_v40 }
  0x76   : > { %v2123_v47 = vmul.f32 -1.442695, %v2758_v44  ;;  %v2124_v50 = vmul.f32 -1.442695, %v2760_v41  ;;  %v2118_v52 = vmul.f32 -1.442695, %v2765_v46 }
  0x77   : > { %2461 = vpow2.f32 %v2120_v37  ;;  %v2119_v53 = vmul.f32 -1.442695, %v2768_v48  ;;  %v2125_v62 = vmul.f32 -1.442695, %v2775_v54 }
  0x78   : > { %2463 = vpow2.f32 %v2121_v38 }
  0x79   : > { %2465 = vpow2.f32 %v2122_v42 }
  0x7a   : > { %2467 = vpow2.f32 %v2123_v47 }
  0x7b   : > { %2469 = vpow2.f32 %v2124_v50 }
  0x7c   : > { %2471 = vpow2.f32 %v2118_v52 }
  0x7d   : > { %v2462_v55 = vpop.eup %2461  ;;  %2473 = vpow2.f32 %v2119_v53 }
  0x7e   : > { %v2464_v57 = vpop.eup %2463  ;;  %v2780_v58 = vadd.f32 1.0, %v2462_v55 }
  0x7f   : > { %v2466_v59 = vpop.eup %2465  ;;  %v2782_v60 = vadd.f32 1.0, %v2464_v57 }
  0x80   : > { %2475 = vrcp.f32 %v2780_v58  ;;  %v2468_v1 = vpop.eup %2467  ;;  %v563_v2 = vand.u32 2147483647, %v2780_v58  ;;  %v565_v5 = vand.u32 2147483648, %v2780_v58  ;;  %v2800_v7 = vadd.f32 1.0, %v2466_v59 }
  0x81   : > { %2477 = vrcp.f32 %v2782_v60  ;;  %v2470_v4 = vpop.eup %2469  ;;  %v578_v6 = vand.u32 2147483647, %v2782_v60  ;;  %v2802_v8 = vadd.f32 1.0, %v2468_v1  ;;  %v580_v9 = vand.u32 2147483648, %v2782_v60 }
  0x82   : > { %v2806_v11 = vadd.f32 1.0, %v2470_v4  ;;  %2479 = vpow2.f32 %v2125_v62  ;;  %v2472_v12 = vpop.eup %2471  ;;  %vm559_vm5 = vweird.f32 %v2780_v58  ;;  %vm574_vm6 = vweird.f32 %v2782_v60 }
  0x83   : > { %2481 = vrcp.f32 %v2800_v7  ;;  %v2474_v15 = vpop.eup %2473  ;;  %v593_v16 = vand.u32 2147483647, %v2800_v7  ;;  %v595_v17 = vand.u32 2147483648, %v2800_v7  ;;  %vm2816_vm7 = vcmp.eq.f32.partialorder %v563_v2, 8.507059e+37 }
  0x84   : > { %2483 = vrcp.f32 %v2802_v8  ;;  %v566_v20 = vor.u32 1.1754944e-38, %v565_v5  ;;  %vm2820_vm8 = vcmp.eq.f32.partialorder %v578_v6, 8.507059e+37  ;;  %v581_v24 = vor.u32 1.1754944e-38, %v580_v9 }
  0x85   : > { %2485 = vrcp.f32 %v2806_v11  ;;  %v608_v25 = vand.u32 2147483647, %v2802_v8  ;;  %v610_v26 = vand.u32 2147483648, %v2802_v8  ;;  %vm589_vm9 = vweird.f32 %v2800_v7 }
  0x86   : > { %v2476_v18 = vpop.eup %2475  ;;  %vm604_vm10 = vweird.f32 %v2802_v8  ;;  %v625_v28 = vand.u32 2147483648, %v2806_v11  ;;  %vm2834_vm12 = vcmp.eq.f32.partialorder %v593_v16, 8.507059e+37  ;;  %v596_v32 = vor.u32 1.1754944e-38, %v595_v17 }
  0x87   : > { %v2478_v22 = vpop.eup %2477  ;;  %v555_v23 = vmul.f32 %v2476_v18, %v2780_v58  ;;  %vm560_vm11 = vweird.f32 %v2476_v18  ;;  %v2838_v33 = vadd.f32 1.0, %v2472_v12  ;;  %vm619_vm14 = vweird.f32 %v2806_v11 }
  0x88   : > { %v570_v27 = vmul.f32 %v2478_v22, %v2782_v60  ;;  %v2832_v29 = vpop.eup %2479  ;;  %vm575_vm13 = vweird.f32 %v2478_v22  ;;  %v623_v37 = vand.u32 2147483647, %v2806_v11  ;;  %vm2846_vm1 = vcmp.eq.f32.partialorder %v608_v25, 8.507059e+37  ;;  %vm2856_vm2 = vmor %vm559_vm5, %vm560_vm11 }
  0x89   : > { %v556_v30 = vsub.f32 1.0, %v555_v23  ;;  %v2482_v35 = vpop.eup %2481  ;;  %v611_v49 = vor.u32 1.1754944e-38, %v610_v26  ;;  %2487 = vrcp.f32 %v2838_v33  ;;  %v2868_v59 = vor.u32 1.1754944e-38, %v625_v28  ;;  %vm2875_vm4 = vmor %vm574_vm6, %vm575_vm13 }
  0x8a   : > { %v571_v43 = vsub.f32 1.0, %v570_v27  ;;  %v2842_v38 = vpop.eup %2483  ;;  %v585_v45 = vmul.f32 %v2482_v35, %v2800_v7  ;;  %v2870_v62 = vadd.f32 1.0, %v2474_v15  ;;  %vm590_vm5 = vweird.f32 %v2482_v35 }
  0x8b   : > { %v557_v42 = vmul.f32 %v2476_v18, %v556_v30  ;;  %v2851_v50 = vpop.eup %2485  ;;  %v600_v57 = vmul.f32 %v2842_v38, %v2802_v8  ;;  %vm605_vm11 = vweird.f32 %v2842_v38  ;;  %vm2883_vm15 = vcmp.eq.f32.partialorder %v623_v37, 8.507059e+37 }
  0x8c   : > { %v572_v53 = vmul.f32 %v2478_v22, %v571_v43  ;;  %v586_v2 = vsub.f32 1.0, %v585_v45  ;;  %v615_v4 = vmul.f32 %v2851_v50, %v2806_v11  ;;  %vm620_vm0 = vweird.f32 %v2851_v50 }
  0x8d   : > { %v558_v1 = vadd.f32 %v2476_v18, %v557_v42  ;;  %v601_v6 = vsub.f32 1.0, %v600_v57  ;;  %vm2891_vm6 = vcmp.eq.s32.totalorder %v704_v10, 7  ;;  %v3845_v15 = vmov 0 }
  0x8e   : > { %v573_v5 = vadd.f32 %v2478_v22, %v572_v53  ;;  %v587_v12 = vmul.f32 %v2482_v35, %v586_v2  ;;  %v3846_v15 = vsel %vm2891_vm6, 4294967295, %v3845_v15  ;;  %v616_v16 = vsub.f32 1.0, %v615_v4 }
  0x8f   : > { %v562_v60 = vsel %vm2856_vm2, %v2476_v18, %v558_v1  ;;  %vm529_vm13 = vweird.f32 %v2838_v33  ;;  %v533_v17 = vand.u32 2147483647, %v2838_v33  ;;  %vm2904_vm2 = vmor %vm589_vm9, %vm590_vm5  ;;  %v602_v26 = vmul.f32 %v2842_v38, %v601_v6  ;;  %v2910_v28 = vpop.eup %2487 }
  0x90   : > { %v567_v23 = vsel %vm2816_vm7, %v566_v20, %v562_v60  ;;  %v577_v25 = vsel %vm2875_vm4, %v2478_v22, %v573_v5  ;;  %v535_v27 = vand.u32 2147483648, %v2838_v33  ;;  %v588_v22 = vadd.f32 %v2482_v35, %v587_v12  ;;  %vm2926_vm7 = vmor %vm604_vm10, %vm605_vm11 }
  0x91   : > { %v582_v19 = vsel %vm2820_vm8, %v581_v24, %v577_v25  ;;  %v2915_v20 = vmul.f32 %v567_v23, %v2752_v36  ;;  %v617_v30 = vmul.f32 %v2851_v50, %v616_v16  ;;  %v603_v43 = vadd.f32 %v2842_v38, %v602_v26 }
  0x92   : > { %v2919_v7 = vmul.f32 %v582_v19, %v2754_v39  ;;  %vm2932_vm8 = vcmp.eq.s32.totalorder %v711_v13, 7  ;;  %v3851_v36 = vmov 0  ;;  %v525_v39 = vmul.f32 %v2910_v28, %v2838_v33 }
  0x93   : > { %v3852_v36 = vsel %vm2932_vm8, 4294967295, %v3851_v36  ;;  %2489 = vrcp.f32 %v2870_v62  ;;  %v866_v21 = vpack.c.bf16 %v2915_v20, %v2915_v20  ;;  %v592_v8 = vsel %vm2904_vm2, %v2482_v35, %v588_v22 }
  0x94   : > { %v809_v24 = vrot.slane %v2915_v20, 1  ;;  %vm2944_vm9 = vcmp.eq.f32.partialorder %v533_v17, 8.507059e+37  ;;  %v867_v45 = vpack.c.bf16 %v2919_v7, %v2919_v7  ;;  %v597_v52 = vsel %vm2834_vm12, %v596_v32, %v592_v8  ;;  %vm2971_vm12 = vmor %vm619_vm14, %vm620_vm0 }
  0x95   : > { %v810_v53 = vrot.slane %v2919_v7, 1  ;;  %vm2955_vm10 = vcmp.eq.s32.totalorder %v718_v14, 7  ;;  %v3855_v57 = vmov 0  ;;  %vm530_vm4 = vweird.f32 %v2910_v28 }
  0x96   : > { %v3856_v57 = vsel %vm2955_vm10, 4294967295, %v3855_v57  ;;  %v910_v35 = vunpack.c.l.b16 %v866_v21  ;;  %v2961_v1 = vmul.f32 %v597_v52, %v2756_v40  ;;  %v607_v58 = vsel %vm2926_vm7, %v2842_v38, %v603_v43  ;;  %vm3011_vm14 = vmor %vm529_vm13, %vm530_vm4 }
  0x97   : > { %v618_v31 = vadd.f32 %v2851_v50, %v617_v30  ;;  %v911_v2 = vunpack.c.l.b16 %v867_v45  ;;  %vm3859_vm5 = vcmp.lt.s32.totalorder %v2771_v51, 7  ;;  %v612_v4 = vsel %vm2846_vm1, %v611_v49, %v607_v58 }
  0x98   : > { %v820_v40 = vsel %vm3859_vm5, %v809_v24, %v810_v53  ;;  %v526_v38 = vsub.f32 1.0, %v525_v39  ;;  %v811_v5 = vrot.slane %v2961_v1, 1  ;;  %v2985_v11 = vmul.f32 %v612_v4, %v2758_v44  ;;  %vm3860_vm0 = vmmov %vm3859_vm5 }
  0x99   : > { %v850_v6 = vsel %vm2862_vm3, 0.0, %v820_v40  ;;  %v868_v60 = vpack.c.bf16 %v2961_v1, %v2961_v1  ;;  %v2490_v12 = vpop.eup %2489  ;;  %v917_v16 = vpack.c.b16 %v911_v2, %v910_v35  ;;  %v622_v47 = vsel %vm2971_vm12, %v2851_v50, %v618_v31  ;;  %vm3864_vm11 = vmmov %vm3860_vm0 }
  0x9a   : > { %v874_v17 = vpack.c.bf16 %v850_v6, %v850_v6  ;;  %v527_v49 = vmul.f32 %v2910_v28, %v526_v38  ;;  %v819_v23 = vsel %vm3860_vm0, %v810_v53, %v811_v5  ;;  %v869_v25 = vpack.c.bf16 %v2985_v11, %v2985_v11  ;;  %vm3869_vm12 = vmmov %vm3860_vm0 }
  0x9b   : > { %v912_v44 = vunpack.c.l.b16 %v868_v60  ;;  %v627_v18 = vsel %vm2883_vm15, %v2868_v59, %v622_v47  ;;  %922 = vrot.lane.b32.xlu0 %v917_v16, %s2600_s20  ;;  %v851_v26 = vsel %vm2891_vm6, 0.0, %v819_v23  ;;  %v812_v22 = vrot.slane %v2985_v11, 1  ;;  %vm3863_vm15 = vmmov %vm3860_vm0 }
  0x9c   : > { %v938_v50 = vunpack.c.l.b16 %v874_v17  ;;  %v3004_v19 = vmul.f32 %v627_v18, %v2760_v41  ;;  %v875_v59 = vpack.c.bf16 %v851_v26, %v851_v26  ;;  %v913_v9 = vunpack.c.l.b16 %v869_v25  ;;  %v2367_v18 = vld [vmem:[%s3797_s4 + $0x28] sm:$0xff]  ;;  %vm3870_vm5 = vmmov %vm3860_vm0 }
  0x9d   : > { %v528_v43 = vadd.f32 %v2910_v28, %v527_v49  ;;  %v536_v37 = vor.u32 1.1754944e-38, %v535_v27  ;;  %v818_v41 = vsel %vm3863_vm15, %v811_v5, %v812_v22  ;;  %v540_v21 = vmul.f32 %v2490_v12, %v2870_v62  ;;  %2393 = vmatpush.bf16.msra.mxu2 %v2367_v18  ;;  %1071 = vmatpush.bf16.msra.mxu0 %v2367_v18 }
  0x9e   : > { %v813_v39 = vrot.slane %v3004_v19, 1  ;;  %vm544_vm1 = vweird.f32 %v2870_v62  ;;  %v939_v8 = vunpack.c.l.b16 %v875_v59  ;;  %v918_v33 = vpack.c.b16 %v913_v9, %v912_v44 }
  0x9f   : > { %v852_v45 = vsel %vm2932_vm8, 0.0, %v818_v41  ;;  %v532_v52 = vsel %vm3011_vm14, %v2910_v28, %v528_v43  ;;  %v541_v58 = vsub.f32 1.0, %v540_v21  ;;  %vm545_vm13 = vweird.f32 %v2490_v12 }
  0xa0   : > { %v817_v27 = vsel %vm3864_vm11, %v812_v22, %v813_v39  ;;  %v876_v53 = vpack.c.bf16 %v852_v45, %v852_v45  ;;  %v537_v35 = vsel %vm2944_vm9, %v536_v37, %v532_v52  ;;  %v945_v31 = vpack.c.b16 %v939_v8, %v938_v50  ;;  %vm546_vm2 = vmor %vm544_vm1, %vm545_vm13  ;;  %v2360_v50 = vld [vmem:[%s3797_s4 + $0x50] sm:$0xff]  ;;  %v2366_v22 = vld [vmem:[%s3797_s4 + $0x20] sm:$0xff] }
  0xa1   : > { %v853_v32 = vsel %vm2955_vm10, 0.0, %v817_v27  ;;  %v548_v2 = vand.u32 2147483647, %v2870_v62  ;;  %v542_v4 = vmul.f32 %v2490_v12, %v541_v58  ;;  %v550_v28 = vand.u32 2147483648, %v2870_v62  ;;  %2394 = vmatpush.bf16.msra.mxu2 %v2366_v22  ;;  %v2359_v52 = vld [vmem:[%s3797_s4 + $0x48] sm:$0xff]  ;;  %1072 = vmatpush.bf16.msra.mxu0 %v2366_v22 }
  0xa2   : > { %v877_v40 = vpack.c.bf16 %v853_v32, %v853_v32  ;;  %v3037_v38 = vadd.s32 8, %v2771_v51  ;;  %950 = vrot.lane.b32.xlu1 %v945_v31, %s3805_s21  ;;  %v940_v42 = vunpack.c.l.b16 %v876_v53  ;;  %v3043_v5 = vmul.f32 %v537_v35, %v2765_v46  ;;  %v2361_v46 = vld [vmem:[%s3797_s4 + $0x58] sm:$0xff] }
  0xa3   : > { %vm549_vm7 = vcmp.eq.f32.partialorder %v548_v2, 8.507059e+37  ;;  %924 = vrot.lane.b32.xlu0 %v918_v33, %s2600_s20  ;;  %v543_v60 = vadd.f32 %v2490_v12, %v542_v4  ;;  %v551_v16 = vor.u32 1.1754944e-38, %v550_v28  ;;  %v523_v17 = vadd.f32 1.0, %v2832_v29  ;;  %2399 = vmatpush.bf16.msra.mxu3 %v2361_v46 }
  0xa4   : > { %v941_v6 = vunpack.c.l.b16 %v877_v40  ;;  %v683_v47 = vand.u32 7, %v2771_v51  ;;  %v864_v23 = vpack.c.bf16 %v3043_v5, %v3043_v5  ;;  %v690_v62 = vand.u32 7, %v3037_v38  ;;  %1144 = vmatpush.bf16.msra.mxu1 %v2361_v46 }
  0xa5   : > { %v547_v49 = vsel %vm546_vm2, %v2490_v12, %v543_v60  ;;  %2491 = vrcp.f32 %v523_v17  ;;  %v807_v12 = vrot.slane %v3043_v5, 1  ;;  %v640_v58 = vand.u32 2147483648, %v523_v17  ;;  %vm3875_vm2 = vmmov %vm3870_vm5 }
  0xa6   : > { %v946_v25 = vpack.c.b16 %v941_v6, %v940_v42  ;;  %v552_v44 = vsel %vm549_vm7, %v551_v16, %v547_v49  ;;  %vm3063_vm9 = vcmp.eq.s32.totalorder %v683_v47, 7  ;;  %v908_v30 = vunpack.c.l.b16 %v864_v23  ;;  %v2358_v6 = vld [vmem:[%s3797_s4 + $0x40] sm:$0xff]  ;;  %vm3876_vm7 = vmmov %vm3875_vm2 }
  0xa7   : > { %v3058_v29 = vmul.f32 %v552_v44, %v2768_v48  ;;  %vm3078_vm4 = vcmp.eq.s32.totalorder %v690_v62, 7  ;;  %2400 = vmatpush.bf16.msra.mxu3 %v2360_v50  ;;  %vm634_vm0 = vweird.f32 %v523_v17  ;;  %v638_v32 = vand.u32 2147483647, %v523_v17 }
  0xa8   : > { %1145 = vmatpush.bf16.msra.mxu1 %v2360_v50  ;;  %v3103_v28 = vadd.s32 48, %v2771_v51  ;;  %v3106_v42 = vadd.s32 56, %v2771_v51  ;;  %v641_v16 = vor.u32 1.1754944e-38, %v640_v58  ;;  %v870_v49 = vpack.c.bf16 %v3004_v19, %v3004_v19 }
  0xa9   : > { %v865_v48 = vpack.c.bf16 %v3058_v29, %v3058_v29  ;;  %v808_v59 = vrot.slane %v3058_v29, 1  ;;  %vm639_vm1 = vcmp.eq.f32.partialorder %v638_v32, 8.507059e+37  ;;  %v663_v58 = vrot.slane %v3058_v29, 7 }
  0xaa   : > { %952 = vrot.lane.b32.xlu1 %v946_v25, %s3805_s21  ;;  %v725_v25 = vand.u32 7, %v3103_v28  ;;  %v732_v44 = vand.u32 7, %v3106_v42  ;;  %v914_v50 = vunpack.c.l.b16 %v870_v49  ;;  %v666_v49 = vrot.slane %v2961_v1, 7 }
  0xab   : > { %v2492_v43 = vpop.eup %2491  ;;  %v909_v37 = vunpack.c.l.b16 %v865_v48  ;;  %v821_v41 = vsel %vm3869_vm12, %v808_v59, %v809_v24  ;;  %v822_v21 = vsel %vm3870_vm5, %v807_v12, %v808_v59  ;;  %v2365_v24 = vld [vmem:[%s3797_s4 + $0x18] sm:$0xff]  ;;  %2401 = vmatpush.bf16.msra.mxu3 %v2359_v52  ;;  %v3873_v59 = vmov 0 }
  0xac   : > { %v848_v8 = vsel %vm3063_vm9, 0.0, %v822_v21  ;;  %v849_v33 = vsel %vm3078_vm4, 0.0, %v821_v41  ;;  %v630_v45 = vmul.f32 %v2492_v43, %v523_v17  ;;  %vm635_vm14 = vweird.f32 %v2492_v43  ;;  %2395 = vmatpush.bf16.msra.mxu2 %v2365_v24  ;;  %1146 = vmatpush.bf16.msra.mxu1 %v2359_v52 }
  0xad   : > { %v916_v27 = vpack.c.b16 %v909_v37, %v908_v30  ;;  %v872_v53 = vpack.c.bf16 %v848_v8, %v848_v8  ;;  %v873_v35 = vpack.c.bf16 %v849_v33, %v849_v33  ;;  %vm636_vm15 = vmor %vm634_vm0, %vm635_vm14  ;;  %1073 = vmatpush.bf16.msra.mxu0 %v2365_v24  ;;  %vm3124_vm11 = vcmp.eq.s32.totalorder %v725_v25, 7 }
  0xae   : > { %v631_v31 = vsub.f32 1.0, %v630_v45  ;;  %v3871_v30 = vmov 0  ;;  %vm3130_vm13 = vcmp.eq.s32.totalorder %v732_v44, 7  ;;  %vm3807_vm12 = vcmp.lt.s32.totalorder %v2771_v51, 1 }
  0xaf   : > { %920 = vrot.lane.b32.xlu0 %v916_v27, %s2600_s20  ;;  %v936_v2 = vunpack.c.l.b16 %v872_v53  ;;  %v937_v40 = vunpack.c.l.b16 %v873_v35  ;;  %2402 = vmatpush.bf16.msra.mxu3 %v2358_v6  ;;  %v3872_v30 = vsel %vm3124_vm11, 4294967295, %v3871_v30  ;;  %v3874_v59 = vsel %vm3130_vm13, 4294967295, %v3873_v59 }
  0xb0   : > { %v632_v4 = vmul.f32 %v2492_v43, %v631_v31  ;;  %1147 = vmatpush.bf16.msra.mxu1 %v2358_v6  ;;  %vm3153_vm5 = vcmp.eq.s32.totalorder %v704_v10, 0  ;;  %v3877_v53 = vmov 0  ;;  %vm3159_vm0 = vcmp.eq.s32.totalorder %v697_v3, 0  ;;  %v2356_v6 = vld [vmem:[%s3797_s4 + $0x30] sm:$0xff] }
  0xb1   : > { %v944_v60 = vpack.c.b16 %v937_v40, %v936_v2  ;;  %v3878_v53 = vsel %vm3153_vm5, 4294967295, %v3877_v53  ;;  %v3879_v35 = vmov 0  ;;  %v2364_v2 = vld [vmem:[%s3797_s4 + $0x10] sm:$0xff]  ;;  %v2357_v40 = vld [vmem:[%s3797_s4 + $0x38] sm:$0xff]  ;;  %vm3209_vm14 = vcmp.eq.s32.totalorder %v711_v13, 0 }
  0xb2   : > { %v633_v17 = vadd.f32 %v2492_v43, %v632_v4  ;;  %v3880_v35 = vsel %vm3159_vm0, 4294967295, %v3879_v35  ;;  %2396 = vmatpush.bf16.msra.mxu2 %v2364_v2  ;;  %v2363_v4 = vld [vmem:[%s3797_s4 + $0x8] sm:$0xff]  ;;  %1074 = vmatpush.bf16.msra.mxu0 %v2364_v2  ;;  %v3881_v1 = vmov 0  ;;  %v3885_v13 = vmov 0 }
  0xb3   : > { %948 = vrot.lane.b32.xlu1 %v944_v60, %s3805_s21  ;;  %2403 = vmatpush.bf16.msra.mxu3 %v2357_v40  ;;  %v2362_v60 = vld [vmem:[%s3797_s4] sm:$0xff]  ;;  %v3882_v1 = vsel %vm3209_vm14, 4294967295, %v3881_v1 }
  0xb4   : > { %v637_v23 = vsel %vm636_vm15, %v2492_v43, %v633_v17  ;;  %1148 = vmatpush.bf16.msra.mxu1 %v2357_v40  ;;  %v667_v17 = vrot.slane %v2985_v11, 7  ;;  %vm3215_vm15 = vcmp.eq.s32.totalorder %v718_v14, 0  ;;  %v3883_v11 = vmov 0 }
  0xb5   : > { %v642_v46 = vsel %vm639_vm1, %v641_v16, %v637_v23  ;;  %v2373_v16 = vld [vmem:[%s3797_s4 + $0x88] sm:$0xff]  ;;  %v3884_v11 = vsel %vm3215_vm15, 4294967295, %v3883_v11  ;;  %vm3228_vm1 = vcmp.eq.s32.totalorder %v725_v25, 0 }
  0xb6   : > { %v3117_v18 = vmul.f32 %v642_v46, %v2775_v54  ;;  %2397 = vmatpush.bf16.msra.mxu2 %v2363_v4  ;;  %1075 = vmatpush.bf16.msra.mxu0 %v2363_v4  ;;  %v668_v46 = vrot.slane %v3004_v19, 7  ;;  %v3886_v13 = vsel %vm3228_vm1, 4294967295, %v3885_v13 }
  0xb7   : > { %2404 = vmatpush.bf16.msra.mxu3 %v2356_v6 }
  0xb8   : > { %v871_v22 = vpack.c.bf16 %v3117_v18, %v3117_v18  ;;  %v814_v48 = vrot.slane %v3117_v18, 1  ;;  %1149 = vmatpush.bf16.msra.mxu1 %v2356_v6  ;;  %v669_v23 = vrot.slane %v3117_v18, 7 }
  0xba   : > { %v915_v54 = vunpack.c.l.b16 %v871_v22  ;;  %v816_v43 = vsel %vm3875_vm2, %v813_v39, %v814_v48  ;;  %v823_v37 = vsel %vm3876_vm7, %v814_v48, %v807_v12  ;;  %v665_v39 = vrot.slane %v2919_v7, 7  ;;  %2398 = vmatpush.bf16.msra.mxu2 %v2362_v60  ;;  %1076 = vmatpush.bf16.msra.mxu0 %v2362_v60 }
  0xbb   : > { %v854_v41 = vsel %vm3124_vm11, 0.0, %v816_v43  ;;  %v855_v21 = vsel %vm3130_vm13, 0.0, %v823_v37  ;;  %v664_v12 = vrot.slane %v2915_v20, 7  ;;  %v673_v22 = vsel %vm3807_vm12, %v666_v49, %v667_v17 }
  0xbc   : > { %v919_v8 = vpack.c.b16 %v915_v54, %v914_v50  ;;  %v878_v33 = vpack.c.bf16 %v854_v41, %v854_v41  ;;  %v879_v45 = vpack.c.bf16 %v855_v21, %v855_v21  ;;  %v2372_v50 = vld [vmem:[%s3797_s4 + $0x80] sm:$0xff]  ;;  %v674_v48 = vsel %vm3807_vm12, %v665_v39, %v666_v49 }
  0xbd   : > { %v675_v7 = vsel %vm3807_vm12, %v664_v12, %v665_v39  ;;  %v676_v61 = vsel %vm3807_vm12, %v663_v58, %v664_v12  ;;  %v803_v19 = vsel %vm3209_vm14, 0.0, %v674_v48  ;;  %v804_v18 = vsel %vm3215_vm15, 0.0, %v673_v22 }
  0xbe   : > { %926 = vrot.lane.b32.xlu2 %v919_v8, %s2600_s20  ;;  %v942_v52 = vunpack.c.l.b16 %v878_v33  ;;  %v943_v24 = vunpack.c.l.b16 %v879_v45  ;;  %v802_v20 = vsel %vm3153_vm5, 0.0, %v675_v7  ;;  %v801_v31 = vsel %vm3159_vm0, 0.0, %v676_v61  ;;  %1226 = vmatpush.bf16.msrb.mxu2 %v2373_v16  ;;  %v2368_v16 = vld [vmem:[%s3797_s4 + $0x60] sm:$0xff] }
  0xbf   : > { %v859_v10 = vpack.c.bf16 %v802_v20, %v802_v20  ;;  %v858_v56 = vpack.c.bf16 %v801_v31, %v801_v31  ;;  %vm3234_vm2 = vcmp.eq.s32.totalorder %v732_v44, 0  ;;  %v671_v14 = vsel %vm3807_vm12, %v668_v46, %v669_v23 }
  0xc0   : > { %v947_v27 = vpack.c.b16 %v943_v24, %v942_v52  ;;  %v3888_v0 = vsel %vm3234_vm2, 4294967295, %v3887_v0  ;;  %v672_v54 = vsel %vm3807_vm12, %v667_v17, %v668_v46  ;;  %v662_v37 = vrot.slane %v3043_v5, 7 }
  0xc1   : > { %v3172_v3 = vunpack.c.l.b16 %v859_v10  ;;  %v3174_v32 = vunpack.c.l.b16 %v858_v56  ;;  %v860_v28 = vpack.c.bf16 %v803_v19, %v803_v19  ;;  %v861_v25 = vpack.c.bf16 %v804_v18, %v804_v18  ;;  %v2369_v10 = vld [vmem:[%s3797_s4 + $0x68] sm:$0xff] }
  0xc2   : > { %1227 = vmatpush.bf16.msrb.mxu2 %v2372_v50  ;;  %v805_v41 = vsel %vm3228_vm1, 0.0, %v672_v54  ;;  %v806_v42 = vsel %vm3234_vm2, 0.0, %v671_v14  ;;  %vm3249_vm7 = vcmp.eq.s32.totalorder %v683_v47, 0  ;;  %v3889_v44 = vmov 0  ;;  %v2370_v47 = vld [vmem:[%s3797_s4 + $0x70] sm:$0xff] }
  0xc3   : > { %v897_v29 = vpack.c.b16 %v3172_v3, %v3174_v32  ;;  %v3890_v44 = vsel %vm3249_vm7, 4294967295, %v3889_v44  ;;  %vm3255_vm12 = vcmp.eq.s32.totalorder %v690_v62, 0  ;;  %v3891_v21 = vmov 0 }
  0xc4   : > { %v3892_v21 = vsel %vm3255_vm12, 4294967295, %v3891_v21  ;;  %vm3893_vm15 = vcmp.lt.s32.totalorder %v2771_v51, 1  ;;  %v862_v33 = vpack.c.bf16 %v805_v41, %v805_v41  ;;  %v863_v45 = vpack.c.bf16 %v806_v42, %v806_v42 }
  0xc5   : > { %v677_v5 = vsel %vm3893_vm15, %v662_v37, %v663_v58  ;;  %vm3894_vm13 = vmmov %vm3893_vm15  ;;  %v892_v52 = vunpack.c.l.b16 %v860_v28  ;;  %v893_v24 = vunpack.c.l.b16 %v861_v25  ;;  %vm3813_vm15 = vcmask 523264  }
  0xc6   : > { %954 = vrot.lane.b32.xlu2 %v947_v27, %s3805_s21  ;;  %1228 = vmatpush.bf16.msrb.mxu2 %v2371_v63  ;;  %v678_v8 = vsel %vm3894_vm13, %v669_v23, %v662_v37  ;;  %v800_v62 = vsel %vm3255_vm12, 0.0, %v677_v5  ;;  %v894_v39 = vunpack.c.l.b16 %v862_v33  ;;  %v895_v12 = vunpack.c.l.b16 %v863_v45  ;;  %s2036_s21 = scalar_lea.hbm %s3803_s10, %s2392_s27 }
  0xc7   : > { %v799_v38 = vsel %vm3249_vm7, 0.0, %v678_v8  ;;  %v898_v58 = vpack.c.b16 %v893_v24, %v892_v52  ;;  %v857_v61 = vpack.c.bf16 %v800_v62, %v800_v62  ;;  %vm3895_vm13 = vcmask 261120   ;;  %s2039_s12 = sshll.u32 %s2036_s21, 4  ;;  %s2040_s12 = int_to_ptr.hbm [resolvable:$true] %s2039_s12 }
  0xc8   : > { %v856_v20 = vpack.c.bf16 %v799_v38, %v799_v38  ;;  %v899_v2 = vpack.c.b16 %v895_v12, %v894_v39  ;;  %vm3896_vm2 = vmmov %vm3895_vm13  ;;  %vm3812_vm7 = vcmask 785408   ;;  %s2549_s18 = sshra.s32 %s2040_s12, 4  ;;  %s2550_s18 = int_to_ptr.hbm [resolvable:$true] %s2549_s18 }
  0xc9   : > { %v889_v60 = vunpack.c.l.b16 %v857_v61  ;;  %vm3902_vm11 = vmmov %vm3896_vm2  ;;  %p2556_p0 = scmp.lt.s32.totalorder %s2550_s18, %s3803_s10 }
  0xca   : > { %1229 = vmatpush.bf16.msrb.mxu2 %v2370_v47  ;;  %v888_v6 = vunpack.c.l.b16 %v856_v20  ;;  %vm3910_vm14 = vmmov %vm3896_vm2 }
  0xcc   : > { %v896_v23 = vpack.c.b16 %v889_v60, %v888_v6 }
  0xce   : > { %1230 = vmatpush.bf16.msrb.mxu2 %v2369_v10 }
  0xd2   : > { %1231 = vmatpush.bf16.msrb.mxu2 %v2368_v16 }
 0x10d   : > { %v923_v43 = vpop.permute.xlu0 %922 }
 0x10e   : > { %v961_v31 = vsel %vm3895_vm13, %v897_v29, %v923_v43  ;;  %vm3897_vm13 = vmmov %vm3896_vm2  ;;  %v2602_v43 = vmov 0  }
 0x10f   : > { %v3288_v37 = vunpack.c.l.b16 %v2602_v43 }
 0x111   : > { %3898 = vst [vmem:[#allocation5_spill] sm:$0xff] %v3288_v37 }
 0x114   : > { %v951_v27 = vpop.permute.xlu1 %950 }
 0x115   : > { %v925_v7 = vpop.permute.xlu0 %924  ;;  %v972_v4 = vsel %vm3813_vm15, %v961_v31, %v951_v27 }
 0x116   : > { %v964_v40 = vsel %vm3896_vm2, %v898_v58, %v925_v7  ;;  %v997_v29 = vunpack.c.h.b16 %v972_v4  ;;  %v996_v25 = vunpack.c.l.b16 %v972_v4 }
 0x118   : > { %v927_v56 = vpop.permute.xlu2 %926 }
 0x119   : > { %v967_v32 = vsel %vm3897_vm13, %v899_v2, %v927_v56  ;;  %vm3899_vm13 = vmmov %vm3896_vm2 }
 0x11c   : > { %v953_v17 = vpop.permute.xlu1 %952 }
 0x11d   : > { %v974_v3 = vsel %vm3813_vm15, %v964_v40, %v953_v17 }
 0x11e   : > { %v998_v49 = vunpack.c.l.b16 %v974_v3  ;;  %2192 = vmatmul.msk.bf16.vlgmr.msra.gmra.mxu3 %vm3812_vm7, %v974_v3  ;;  %v999_v50 = vunpack.c.h.b16 %v974_v3 }
 0x120   : > { %v955_v46 = vpop.permute.xlu2 %954  ;;  %v1018_v22 = vpack.c.b16 %v998_v49, %v997_v29 }
 0x121   : > { %v921_v48 = vpop.permute.xlu0 %920  ;;  %v976_v19 = vsel %vm3813_vm15, %v967_v32, %v955_v46  ;;  %v2452_v32 = vld [vmem:[%s3798_s5] ss:$0 sm:$0xff] }
 0x122   : > { %2164 = vmatmul.msk.bf16.vlgmr.msra.gmra.mxu2 %vm3812_vm7, %v1018_v22  ;;  %v1000_v18 = vunpack.c.l.b16 %v976_v19  ;;  %v958_v63 = vsel %vm3896_vm2, %v896_v23, %v921_v48  ;;  %v1001_v33 = vunpack.c.h.b16 %v976_v19 }
 0x124   : > { %v1019_v14 = vpack.c.b16 %v1000_v18, %v999_v50  ;;  %v1184_v45 = vpack.c.b16 %v3288_v37, %v1001_v33 }
 0x125   : > { %v949_v54 = vpop.permute.xlu1 %948 }
 0x126   : > { %v970_v28 = vsel %vm3813_vm15, %v958_v63, %v949_v54  ;;  %vm3901_vm15 = vmmov %vm3896_vm2 }
 0x127   : > { %v994_v41 = vunpack.c.l.b16 %v970_v28  ;;  %v995_v42 = vunpack.c.h.b16 %v970_v28  ;;  %2190 = vmatmul.msk.bf16.vlgmr.msra.gmra.mxu1 %vm3812_vm7, %v970_v28 }
 0x129   : > { %v1016_v5 = vpack.c.b16 %v994_v41, %v3288_v37  ;;  %v1017_v8 = vpack.c.b16 %v996_v25, %v995_v42 }
 0x12b   : > { %2162 = vmatmul.msk.bf16.vlgmr.msra.gmra.mxu0 %vm3812_vm7, %v1016_v5 }
 0x12e   : > { %2193 = vmatmul.msk.bf16.gmra.mxu3 %vm3812_vm7, %v976_v19 }
 0x132   : > { %2165 = vmatmul.msk.bf16.gmra.mxu2 %vm3812_vm7, %v1019_v14 }
 0x137   : > { %2191 = vmatmul.msk.bf16.gmra.mxu1 %vm3812_vm7, %v972_v4 }
 0x13b   : > { %2163 = vmatmul.msk.bf16.gmra.mxu0 %vm3812_vm7, %v1017_v8 }
 0x142   : > { %2230 = vmatmul.msk.bf16.vlgmr.msrb.gmra.mxu2 %vm3812_vm7, %v1017_v8 }
 0x152   : > { %2231 = vmatmul.msk.bf16.gmra.mxu2 %vm3812_vm7, %v1018_v22  ;;  %v2453_v22 = vld [vmem:[%s371_s26] ss:$0 sm:$0xff]  ;;  %s3938_s26 = smov 64  }
 0x162   : > { %2232 = vmatmul.msk.bf16.gmra.mxu2 %vm3812_vm7, %v1019_v14 }
 0x172   : > { %2233 = vmatmul.msk.bf16.gmra.mxu2 %vm3812_vm7, %v1184_v45  ;;  %vm3900_vm7 = vmmov %vm3896_vm2 }
 0x1a1   : > { %v1161_v31 = vpop.f32.mrf.mxu3 }
 0x1a4   : > { %v1151_v62 = vpop.f32.mrf.mxu1 }
 0x1a5   : > { %v1088_v52 = vpop.f32.mrf.mxu2 }
 0x1a6   : > { %v1162_v46 = vadd.f32 %v1161_v31, %v1088_v52 }
 0x1a8   : > { %v1078_v38 = vpop.f32.mrf.mxu0 }
 0x1a9   : > { %v1152_v4 = vadd.f32 %v1151_v62, %v1078_v38  ;;  %v1163_v54 = vpop.f32.mrf.mxu3 }
 0x1ac   : > { %v1153_v58 = vpop.f32.mrf.mxu1 }
 0x1ad   : > { %v1090_v24 = vpop.f32.mrf.mxu2 }
 0x1ae   : > { %v1164_v5 = vadd.f32 %v1163_v54, %v1090_v24 }
 0x1b0   : > { %v1080_v12 = vpop.f32.mrf.mxu0 }
 0x1b1   : > { %v1154_v56 = vadd.f32 %v1153_v58, %v1080_v12 }
 0x1b4   : > { %v1156_v61 = vpop.f32.mrf.mxu1 }
 0x1b5   : > { %v1093_v47 = vpop.f32.mrf.mxu2 }
 0x1b8   : > { %v1083_v20 = vpop.f32.mrf.mxu0 }
 0x1b9   : > { %v1157_v6 = vadd.f32 %v1156_v61, %v1083_v20  ;;  %v1166_v20 = vpop.f32.mrf.mxu3 }
 0x1bc   : > { %v1158_v16 = vpop.f32.mrf.mxu1 }
 0x1bd   : > { %v1095_v27 = vpop.f32.mrf.mxu2 }
 0x1c0   : > { %v1085_v2 = vpop.f32.mrf.mxu0 }
 0x1c1   : > { %v1159_v17 = vadd.f32 %v1158_v16, %v1085_v2  ;;  %v1168_v16 = vpop.f32.mrf.mxu3 }
 0x1c5   : > { %v1233_v39 = vpop.f32.mrf.mxu2 }
 0x1c6   : > { %v1253_v3 = vadd.f32 %v1233_v39, %v1152_v4 }
 0x1c8   : > { %v1264_v50 = vadd.f32 %v2452_v32, %v1253_v3 }
 0x1ca   : > { %v1276_v43 = vadd.f32 %v2453_v22, %v1264_v50 }
 0x1cc   : > { %v1286_v8 = vsel %vm3896_vm2, %v1276_v43, 0.0 }
 0x1cd   : > { %v1235_v7 = vpop.f32.mrf.mxu2 }
 0x1ce   : > { %v1254_v60 = vadd.f32 %v1235_v7, %v1154_v56  ;;  %v1167_v56 = vadd.f32 %v1166_v20, %v1093_v47 }
 0x1d0   : > { %v1265_v49 = vadd.f32 %v2452_v32, %v1254_v60 }
 0x1d2   : > { %v1277_v18 = vadd.f32 %v2453_v22, %v1265_v49 }
 0x1d4   : > { %v1287_v41 = vsel %vm3899_vm13, %v1277_v18, 0.0  ;;  %vm3903_vm13 = vmmov %vm3896_vm2 }
 0x1d5   : > { %v1238_v10 = vpop.f32.mrf.mxu2  ;;  %v1288_v52 = vadd.f32 %v1287_v41, %v1286_v8 }
 0x1d6   : > { %v1255_v29 = vadd.f32 %v1238_v10, %v1157_v6 }
 0x1d8   : > { %v1266_v48 = vadd.f32 %v2452_v32, %v1255_v29 }
 0x1da   : > { %v1278_v28 = vadd.f32 %v2453_v22, %v1266_v48 }
 0x1dc   : > { %v1289_v33 = vsel %vm3900_vm7, %v1278_v28, 0.0  ;;  %vm3904_vm7 = vmmov %vm3896_vm2 }
 0x1dd   : > { %v1240_v40 = vpop.f32.mrf.mxu2  ;;  %v1290_v12 = vadd.f32 %v1289_v33, %v1288_v52 }
 0x1de   : > { %v1256_v23 = vadd.f32 %v1240_v40, %v1159_v17  ;;  %v1169_v17 = vadd.f32 %v1168_v16, %v1095_v27 }
 0x1e0   : > { %v1267_v63 = vadd.f32 %v2452_v32, %v1256_v23 }
 0x1e2   : > { %v1279_v42 = vadd.f32 %v2453_v22, %v1267_v63 }
 0x1e4   : > { %v1291_v62 = vsel %vm3901_vm15, %v1279_v42, 0.0  ;;  %vm3906_vm15 = vmmov %vm3896_vm2 }
 0x1e5   : > { %v1243_v19 = vpop.f32.mrf.mxu2  ;;  %v1292_v61 = vadd.f32 %v1291_v62, %v1290_v12 }
 0x1e6   : > { %v1257_v14 = vadd.f32 %v1243_v19, %v1162_v46 }
 0x1e8   : > { %v1268_v25 = vadd.f32 %v2452_v32, %v1257_v14 }
 0x1ea   : > { %v1280_v45 = vadd.f32 %v2453_v22, %v1268_v25 }
 0x1ec   : > { %v1293_v58 = vsel %vm3902_vm11, %v1280_v45, 0.0  ;;  %vm3905_vm11 = vmmov %vm3896_vm2 }
 0x1ed   : > { %v1245_v38 = vpop.f32.mrf.mxu2  ;;  %v1294_v31 = vadd.f32 %v1293_v58, %v1292_v61 }
 0x1ee   : > { %v1258_v39 = vadd.f32 %v1245_v38, %v1164_v5 }
 0x1f0   : > { %v1269_v7 = vadd.f32 %v2452_v32, %v1258_v39 }
 0x1f2   : > { %v1281_v10 = vadd.f32 %v2453_v22, %v1269_v7 }
 0x1f4   : > { %v1295_v24 = vsel %vm3903_vm13, %v1281_v10, 0.0  ;;  %vm3907_vm13 = vmmov %vm3896_vm2 }
 0x1f5   : > { %v1296_v2 = vadd.f32 %v1295_v24, %v1294_v31  ;;  %v1248_v40 = vpop.f32.mrf.mxu2 }
 0x1f6   : > { %v1259_v4 = vadd.f32 %v1248_v40, %v1167_v56 }
 0x1f8   : > { %v1270_v6 = vadd.f32 %v2452_v32, %v1259_v4 }
 0x1fa   : > { %v1282_v60 = vadd.f32 %v2453_v22, %v1270_v6 }
 0x1fc   : > { %v1297_v3 = vsel %vm3904_vm7, %v1282_v60, 0.0  ;;  %vm3908_vm7 = vmmov %vm3896_vm2 }
 0x1fd   : > { %v1298_v29 = vadd.f32 %v1297_v3, %v1296_v2  ;;  %v1250_v49 = vpop.f32.mrf.mxu2 }
 0x1fe   : > { %v1260_v23 = vadd.f32 %v1250_v49, %v1169_v17 }
 0x200   : > { %v1271_v46 = vadd.f32 %v2452_v32, %v1260_v23 }
 0x202   : > { %v1283_v50 = vadd.f32 %v2453_v22, %v1271_v46 }
 0x204   : > { %v1299_v48 = vsel %vm3905_vm11, %v1283_v50, 0.0  ;;  %vm3909_vm11 = vmmov %vm3896_vm2 }
 0x205   : > { %v1300_v19 = vadd.f32 %v1299_v48, %v1298_v29 }
 0x207   : > { %v1301_v47 = vrot.slane %v1300_v19, 4 }
 0x209   : > { %v1302_v63 = vadd.f32 %v1301_v47, %v1300_v19 }
 0x20b   : > { %v1303_v14 = vrot.slane %v1302_v63, 2 }
 0x20d   : > { %v1304_v54 = vadd.f32 %v1303_v14, %v1302_v63 }
 0x20f   : > { %v1305_v25 = vrot.slane %v1304_v54, 1 }
 0x211   : > { %v1306_v41 = vadd.f32 %v1305_v25, %v1304_v54 }
 0x213   : > { %v1307_v5 = vmul.f32 %v1306_v41, %v2734_v34 }
 0x215   : > { %v1308_v8 = vsub.f32 %v1276_v43, %v1307_v5  ;;  %v1309_v27 = vsub.f32 %v1277_v18, %v1307_v5  ;;  %v1310_v33 = vsub.f32 %v1278_v28, %v1307_v5  ;;  %v1311_v52 = vsub.f32 %v1279_v42, %v1307_v5 }
 0x216   : > { %v1312_v38 = vsub.f32 %v1280_v45, %v1307_v5  ;;  %v1313_v62 = vsub.f32 %v1281_v10, %v1307_v5  ;;  %v1314_v39 = vsub.f32 %v1282_v60, %v1307_v5  ;;  %v1315_v43 = vsub.f32 %v1283_v50, %v1307_v5 }
 0x217   : > { %v1316_v32 = vmul.f32 %v1308_v8, %v1308_v8  ;;  %v1317_v22 = vmul.f32 %v1309_v27, %v1309_v27  ;;  %v1318_v12 = vmul.f32 %v1310_v33, %v1310_v33  ;;  %v1319_v58 = vmul.f32 %v1311_v52, %v1311_v52 }
 0x218   : > { %v1320_v31 = vmul.f32 %v1312_v38, %v1312_v38  ;;  %v1321_v18 = vmul.f32 %v1313_v62, %v1313_v62  ;;  %v1322_v45 = vmul.f32 %v1314_v39, %v1314_v39  ;;  %v1323_v40 = vmul.f32 %v1315_v43, %v1315_v43 }
 0x219   : > { %v1324_v7 = vsel %vm3906_vm15, %v1316_v32, 0.0  ;;  %v1325_v20 = vsel %vm3896_vm2, %v1317_v22, 0.0  ;;  %v1327_v56 = vsel %vm3907_vm13, %v1318_v12, 0.0  ;;  %v1329_v28 = vsel %vm3908_vm7, %v1319_v58, 0.0  ;;  %vm3911_vm15 = vmmov %vm3896_vm2  ;;  %v2454_v32 = vld [vmem:[%s3799_s6] ss:$0 sm:$0xff] }
 0x21a   : > { %v1326_v61 = vadd.f32 %v1325_v20, %v1324_v7  ;;  %v1331_v10 = vsel %vm3909_vm11, %v1320_v31, 0.0  ;;  %v1333_v4 = vsel %vm3910_vm14, %v1321_v18, 0.0  ;;  %v1335_v60 = vsel %vm3911_vm15, %v1322_v45, 0.0 }
 0x21b   : > { %v1337_v17 = vsel %vm3896_vm2, %v1323_v40, 0.0 }
 0x21c   : > { %v1328_v24 = vadd.f32 %v1327_v56, %v1326_v61 }
 0x21e   : > { %v1330_v42 = vadd.f32 %v1329_v28, %v1328_v24 }
 0x220   : > { %v1332_v2 = vadd.f32 %v1331_v10, %v1330_v42 }
 0x222   : > { %v1334_v6 = vadd.f32 %v1333_v4, %v1332_v2 }
 0x224   : > { %v1336_v16 = vadd.f32 %v1335_v60, %v1334_v6 }
 0x226   : > { %v1338_v3 = vadd.f32 %v1337_v17, %v1336_v16 }
 0x228   : > { %v1339_v29 = vrot.slane %v1338_v3, 4 }
 0x22a   : > { %v1340_v49 = vadd.f32 %v1339_v29, %v1338_v3 }
 0x22c   : > { %v1341_v23 = vrot.slane %v1340_v49, 2 }
 0x22e   : > { %v1342_v46 = vadd.f32 %v1341_v23, %v1340_v49 }
 0x230   : > { %v1343_v50 = vrot.slane %v1342_v46, 1 }
 0x232   : > { %v1344_v48 = vadd.f32 %v1343_v50, %v1342_v46 }
 0x234   : > { %v1345_v19 = vmul.f32 %v1344_v48, %v2734_v34  ;;  %v2455_v34 = vld [vmem:[%s3800_s7] ss:$0 sm:$0xff] }
 0x236   : > { %v1346_v47 = vadd.f32 1e-05, %v1345_v19 }
 0x238   : > { %2493 = vrsqrt.f32 %v1346_v47  ;;  %vm1353_vm13 = vweird.f32 %v1346_v47 }
 0x23e   : > { %v2494_v63 = vpop.eup %2493 }
 0x23f   : > { %v1348_v14 = vmul.f32 %v2494_v63, %v1346_v47  ;;  %vm1354_vm14 = vweird.f32 %v2494_v63 }
 0x240   : > { %vm1355_vm7 = vmor %vm1353_vm13, %vm1354_vm14 }
 0x241   : > { %v1349_v54 = vmul.f32 %v2494_v63, %v1348_v14 }
 0x243   : > { %v1350_v25 = vmul.f32 0.5, %v1349_v54 }
 0x245   : > { %v1351_v41 = vsub.f32 1.5, %v1350_v25 }
 0x247   : > { %v1352_v5 = vmul.f32 %v2494_v63, %v1351_v41 }
 0x249   : > { %v1356_v22 = vsel %vm1355_vm7, %v2494_v63, %v1352_v5 }
 0x24a   : > { %v1362_v12 = vmul.f32 %v1356_v22, %v1313_v62  ;;  %v1363_v58 = vmul.f32 %v1356_v22, %v1314_v39  ;;  %v1364_v7 = vmul.f32 %v1356_v22, %v1315_v43  ;;  %v1359_v20 = vmul.f32 %v1356_v22, %v1310_v33 }
 0x24b   : > { %v1360_v61 = vmul.f32 %v1356_v22, %v1311_v52  ;;  %v1357_v31 = vmul.f32 %v1356_v22, %v1308_v8  ;;  %v1358_v56 = vmul.f32 %v1356_v22, %v1309_v27  ;;  %v1361_v24 = vmul.f32 %v1356_v22, %v1312_v38 }
 0x24c   : > { %v1375_v18 = vmul.f32 %v2454_v32, %v1364_v7  ;;  %v1370_v28 = vmul.f32 %v2454_v32, %v1359_v20  ;;  %v1373_v42 = vmul.f32 %v2454_v32, %v1362_v12  ;;  %v1374_v39 = vmul.f32 %v2454_v32, %v1363_v58 }
 0x24d   : > { %v1371_v45 = vmul.f32 %v2454_v32, %v1360_v61  ;;  %v1368_v10 = vmul.f32 %v2454_v32, %v1357_v31  ;;  %v1369_v2 = vmul.f32 %v2454_v32, %v1358_v56  ;;  %v1372_v40 = vmul.f32 %v2454_v32, %v1361_v24 }
 0x24e   : > { %v3339_v4 = vadd.f32 %v2455_v34, %v1375_v18  ;;  %v3341_v62 = vadd.f32 %v2455_v34, %v1370_v28  ;;  %v3353_v38 = vadd.f32 %v2455_v34, %v1373_v42  ;;  %v3358_v3 = vadd.f32 %v2455_v34, %v1374_v39 }
 0x24f   : > { %v3343_v43 = vadd.f32 %v2455_v34, %v1371_v45  ;;  %v3345_v6 = vadd.f32 %v2455_v34, %v1368_v10  ;;  %v3347_v33 = vadd.f32 %v2455_v34, %v1369_v2  ;;  %v3349_v8 = vadd.f32 %v2455_v34, %v1372_v40 }
 0x250   : > { %v2241_v27 = vmul.f32 -1.442695, %v3339_v4  ;;  %v2236_v52 = vmul.f32 -1.442695, %v3341_v62  ;;  %v2239_v49 = vmul.f32 -1.442695, %v3353_v38 }
 0x251   : > { %v2237_v60 = vmul.f32 -1.442695, %v3343_v43  ;;  %v2234_v16 = vmul.f32 -1.442695, %v3345_v6  ;;  %v2235_v17 = vmul.f32 -1.442695, %v3347_v33 }
 0x252   : > { %2495 = vpow2.f32 %v2241_v27  ;;  %v2238_v29 = vmul.f32 -1.442695, %v3349_v8  ;;  %v2240_v23 = vmul.f32 -1.442695, %v3358_v3 }
 0x253   : > { %2497 = vpow2.f32 %v2236_v52 }
 0x254   : > { %2499 = vpow2.f32 %v2237_v60 }
 0x255   : > { %2501 = vpow2.f32 %v2234_v16 }
 0x256   : > { %2503 = vpow2.f32 %v2235_v17 }
 0x257   : > { %2505 = vpow2.f32 %v2238_v29 }
 0x258   : > { %v2496_v46 = vpop.eup %2495  ;;  %2507 = vpow2.f32 %v2239_v49 }
 0x259   : > { %v2498_v50 = vpop.eup %2497  ;;  %v3363_v19 = vadd.f32 1.0, %v2496_v46  ;;  %2509 = vpow2.f32 %v2240_v23 }
 0x25a   : > { %v2500_v48 = vpop.eup %2499  ;;  %v3365_v47 = vadd.f32 1.0, %v2498_v50 }
 0x25b   : > { %v2502_v63 = vpop.eup %2501  ;;  %v3367_v14 = vadd.f32 1.0, %v2500_v48 }
 0x25c   : > { %v2504_v54 = vpop.eup %2503  ;;  %2511 = vrcp.f32 %v3365_v47  ;;  %v3372_v5 = vadd.f32 1.0, %v2502_v63  ;;  %v1458_v22 = vand.u32 2147483647, %v3365_v47  ;;  %v1460_v12 = vand.u32 2147483648, %v3365_v47 }
 0x25d   : > { %v2506_v25 = vpop.eup %2505  ;;  %2513 = vrcp.f32 %v3367_v14  ;;  %v3374_v32 = vadd.f32 1.0, %v2504_v54  ;;  %v1475_v58 = vand.u32 2147483648, %v3367_v14  ;;  %v1473_v34 = vand.u32 2147483647, %v3367_v14 }
 0x25e   : > { %v2508_v41 = vpop.eup %2507  ;;  %2515 = vrcp.f32 %v3363_v19  ;;  %v3379_v7 = vadd.f32 1.0, %v2506_v25  ;;  %v1430_v20 = vand.u32 2147483648, %v3372_v5  ;;  %vm3393_vm2 = vcmp.eq.f32.partialorder %v1458_v22, 8.507059e+37 }
 0x25f   : > { %2517 = vrcp.f32 %v3372_v5  ;;  %v2510_v61 = vpop.eup %2509  ;;  %v3385_v31 = vadd.f32 1.0, %v2508_v41  ;;  %v1445_v18 = vand.u32 2147483648, %v3374_v32  ;;  %v1461_v10 = vor.u32 1.1754944e-38, %v1460_v12 }
 0x260   : > { %2519 = vrcp.f32 %v3374_v32  ;;  %v1476_v2 = vor.u32 1.1754944e-38, %v1475_v58  ;;  %v1428_v40 = vand.u32 2147483647, %v3372_v5  ;;  %vm3401_vm14 = vcmp.eq.f32.partialorder %v1473_v34, 8.507059e+37 }
 0x261   : > { %2521 = vrcp.f32 %v3379_v7  ;;  %v3405_v60 = vor.u32 1.1754944e-38, %v1430_v20  ;;  %v1443_v16 = vand.u32 2147483647, %v3374_v32  ;;  %v3408_v17 = vadd.f32 1.0, %v2510_v61 }
 0x262   : > { %v2512_v24 = vpop.eup %2511  ;;  %v1490_v49 = vand.u32 2147483648, %v3379_v7  ;;  %2523 = vrcp.f32 %v3385_v31  ;;  %v1446_v50 = vor.u32 1.1754944e-38, %v1445_v18  ;;  %v1488_v48 = vand.u32 2147483647, %v3379_v7 }
 0x263   : > { %v2514_v28 = vpop.eup %2513  ;;  %v1450_v42 = vmul.f32 %v2512_v24, %v3365_v47  ;;  %vm1455_vm13 = vweird.f32 %v2512_v24  ;;  %vm3416_vm0 = vcmp.eq.f32.partialorder %v1428_v40, 8.507059e+37  ;;  %v1503_v22 = vand.u32 2147483647, %v3385_v31 }
 0x264   : > { %v3398_v39 = vpop.eup %2515  ;;  %v1465_v27 = vmul.f32 %v2514_v28, %v3367_v14  ;;  %vm3423_vm11 = vcmp.eq.f32.partialorder %v1443_v16, 8.507059e+37  ;;  %v1505_v61 = vand.u32 2147483648, %v3385_v31  ;;  %vm3920_vm7 = vweird.f32 %v3365_v47 }
 0x265   : > { %v1451_v29 = vsub.f32 1.0, %v1450_v42  ;;  %v2518_v23 = vpop.eup %2517  ;;  %vm1456_vm5 = vmor %vm3920_vm7, %vm1455_vm13  ;;  %vm3432_vm1 = vcmp.eq.f32.partialorder %v1488_v48, 8.507059e+37  ;;  %vm1499_vm12 = vweird.f32 %v3385_v31  ;;  %2525 = vrcp.f32 %v3408_v17 }
 0x266   : > { %v1466_v46 = vsub.f32 1.0, %v1465_v27  ;;  %v2520_v63 = vpop.eup %2519  ;;  %v1420_v25 = vmul.f32 %v2518_v23, %v3372_v5  ;;  %v1491_v27 = vor.u32 1.1754944e-38, %v1490_v49  ;;  %vm3923_vm10 = vweird.f32 %v2514_v28 }
 0x267   : > { %v1452_v54 = vmul.f32 %v2512_v24, %v1451_v29  ;;  %v2522_v12 = vpop.eup %2521  ;;  %v1435_v34 = vmul.f32 %v2520_v63, %v3374_v32  ;;  %vm1440_vm15 = vweird.f32 %v2520_v63  ;;  %vm3924_vm6 = vweird.f32 %v3367_v14 }
 0x268   : > { %v1467_v58 = vmul.f32 %v2514_v28, %v1466_v46  ;;  %v1421_v42 = vsub.f32 1.0, %v1420_v25  ;;  %v1480_v40 = vmul.f32 %v2522_v12, %v3379_v7  ;;  %v2524_v16 = vpop.eup %2523  ;;  %vm1471_vm8 = vmor %vm3924_vm6, %vm3923_vm10  ;;  %vm1485_vm13 = vweird.f32 %v2522_v12 }
 0x269   : > { %v1453_v18 = vadd.f32 %v2512_v24, %v1452_v54  ;;  %v1436_v46 = vsub.f32 1.0, %v1435_v34  ;;  %v1495_v34 = vmul.f32 %v2524_v16, %v3385_v31  ;;  %vm3444_vm7 = vcmp.eq.f32.partialorder %v1503_v22, 8.507059e+37 }
 0x26a   : > { %v1468_v29 = vadd.f32 %v2514_v28, %v1467_v58  ;;  %v1422_v49 = vmul.f32 %v2518_v23, %v1421_v42  ;;  %v1481_v47 = vsub.f32 1.0, %v1480_v40  ;;  %vm3927_vm6 = vweird.f32 %v2518_v23 }
 0x26b   : > { %v1457_v54 = vsel %vm1456_vm5, %v2512_v24, %v1453_v18  ;;  %v1437_v58 = vmul.f32 %v2520_v63, %v1436_v46  ;;  %v1496_v45 = vsub.f32 1.0, %v1495_v34  ;;  %vm3929_vm5 = vweird.f32 %v3374_v32 }
 0x26c   : > { %v1462_v25 = vsel %vm3393_vm2, %v1461_v10, %v1457_v54  ;;  %v1472_v48 = vsel %vm1471_vm8, %v2514_v28, %v1468_v29  ;;  %v1423_v18 = vadd.f32 %v2518_v23, %v1422_v49  ;;  %v1482_v42 = vmul.f32 %v2522_v12, %v1481_v47  ;;  %vm1441_vm2 = vmor %vm3929_vm5, %vm1440_vm15 }
 0x26d   : > { %v1477_v24 = vsel %vm3401_vm14, %v1476_v2, %v1472_v48  ;;  %v3451_v14 = vmul.f32 %v1462_v25, %v3341_v62  ;;  %vm3928_vm8 = vweird.f32 %v3372_v5  ;;  %v1438_v28 = vadd.f32 %v2520_v63, %v1437_v58  ;;  %v2526_v2 = vpop.eup %2525 }
 0x26e   : > { %v3454_v40 = vmul.f32 %v1477_v24, %v3343_v43  ;;  %vm1426_vm10 = vmor %vm3928_vm8, %vm3927_vm6  ;;  %v1506_v10 = vor.u32 1.1754944e-38, %v1505_v61  ;;  %v1483_v62 = vadd.f32 %v2522_v12, %v1482_v42  ;;  %vm1500_vm14 = vweird.f32 %v2524_v16 }
 0x26f   : > { %v1606_v22 = vpack.c.bf16 %v3451_v14, %v3451_v14  ;;  %v1427_v52 = vsel %vm1426_vm10, %v2518_v23, %v1423_v18  ;;  %v1442_v29 = vsel %vm1441_vm2, %v2520_v63, %v1438_v28  ;;  %vm3930_vm6 = vweird.f32 %v3379_v7 }
 0x270   : > { %v1607_v43 = vpack.c.bf16 %v3454_v40, %v3454_v40  ;;  %v1432_v5 = vsel %vm3416_vm0, %v3405_v60, %v1427_v52  ;;  %vm1486_vm8 = vmor %vm3930_vm6, %vm1485_vm13  ;;  %v1497_v23 = vmul.f32 %v2524_v16, %v1496_v45  ;;  %v1447_v32 = vsel %vm3423_vm11, %v1446_v50, %v1442_v29 }
 0x271   : > { %v1650_v61 = vunpack.c.l.b16 %v1606_v22  ;;  %v3475_v46 = vmul.f32 %v1432_v5, %v3345_v6  ;;  %v1487_v54 = vsel %vm1486_vm8, %v2522_v12, %v1483_v62  ;;  %vm1514_vm15 = vweird.f32 %v3408_v17  ;;  %vm1501_vm0 = vmor %vm1499_vm12, %vm1500_vm14 }
 0x272   : > { %v1651_v49 = vunpack.c.l.b16 %v1607_v43  ;;  %v3479_v41 = vmul.f32 %v1447_v32, %v3347_v33  ;;  %v1574_v60 = vrot.slane %v3451_v14, 1  ;;  %v1498_v63 = vadd.f32 %v2524_v16, %v1497_v23 }
 0x273   : > { %v1604_v7 = vpack.c.bf16 %v3475_v46, %v3475_v46  ;;  %v1572_v47 = vrot.slane %v3475_v46, 1  ;;  %v1492_v50 = vsel %vm3432_vm1, %v1491_v27, %v1487_v54  ;;  %v1510_v6 = vmul.f32 %v2526_v2, %v3408_v17 }
 0x274   : > { %v1657_v12 = vpack.c.b16 %v1651_v49, %v1650_v61  ;;  %v1605_v33 = vpack.c.bf16 %v3479_v41, %v3479_v41  ;;  %v1573_v20 = vrot.slane %v3479_v41, 1  ;;  %v1502_v25 = vsel %vm1501_vm0, %v2524_v16, %v1498_v63 }
 0x275   : > { %v1648_v48 = vunpack.c.l.b16 %v1604_v7  ;;  %v1507_v58 = vsel %vm3444_vm7, %v1506_v10, %v1502_v25  ;;  %v1511_v34 = vsub.f32 1.0, %v1510_v6  ;;  %v1518_v56 = vand.u32 2147483647, %v3408_v17 }
 0x276   : > { %1662 = vrot.lane.b32.xlu1 %v1657_v12, %s2600_s20  ;;  %v1649_v31 = vunpack.c.l.b16 %v1605_v33  ;;  %vm3931_vm12 = vcmp.lt.s32.totalorder %v2771_v51, 7  ;;  %v1520_v16 = vand.u32 2147483648, %v3408_v17  ;;  %vm1515_vm11 = vweird.f32 %v2526_v2 }
 0x277   : > { %v1585_v27 = vsel %vm3931_vm12, %v1573_v20, %v1574_v60  ;;  %vm3932_vm1 = vmmov %vm3931_vm12  ;;  %v1512_v42 = vmul.f32 %v2526_v2, %v1511_v34  ;;  %vm3509_vm13 = vcmp.eq.f32.partialorder %v1518_v56, 8.507059e+37  ;;  %v3514_v62 = vmul.f32 %v1492_v50, %v3349_v8 }
 0x278   : > { %v1586_v24 = vsel %vm3932_vm1, %v1572_v47, %v1573_v20  ;;  %v1589_v18 = vsel %vm3078_vm4, 0.0, %v1585_v27  ;;  %v1656_v28 = vpack.c.b16 %v1649_v31, %v1648_v48  ;;  %v3517_v43 = vmul.f32 %v1507_v58, %v3353_v38  ;;  %vm3935_vm4 = vmmov %vm3932_vm1 }
 0x279   : > { %v1588_v37 = vsel %vm3063_vm9, 0.0, %v1586_v24  ;;  %v1613_v10 = vpack.c.bf16 %v1589_v18, %v1589_v18  ;;  %v1513_v52 = vadd.f32 %v2526_v2, %v1512_v42  ;;  %v1575_v26 = vrot.slane %v3454_v40, 1  ;;  %vm1516_vm9 = vmor %vm1514_vm15, %vm1515_vm11 }
 0x27a   : > { %v1612_v45 = vpack.c.bf16 %v1588_v37, %v1588_v37  ;;  %1660 = vrot.lane.b32.xlu2 %v1656_v28, %s2600_s20  ;;  %v1521_v29 = vor.u32 1.1754944e-38, %v1520_v16  ;;  %v1525_v23 = vmul.f32 %v3398_v39, %v3363_v19  ;;  %v1576_v8 = vrot.slane %v3514_v62, 1  ;;  %vm3936_vm10 = vmmov %vm3932_vm1 }
 0x27b   : > { %v1677_v5 = vunpack.c.l.b16 %v1613_v10  ;;  %v1517_v61 = vsel %vm1516_vm9, %v2526_v2, %v1513_v52  ;;  %v1577_v32 = vrot.slane %v3517_v43, 1  ;;  %v1584_v38 = vsel %vm3935_vm4, %v1574_v60, %v1575_v26  ;;  %vm3937_vm5 = vmmov %vm3932_vm1 }
 0x27c   : > { %v1676_v9 = vunpack.c.l.b16 %v1612_v45  ;;  %v1522_v49 = vsel %vm3509_vm13, %v1521_v29, %v1517_v61  ;;  %v1590_v17 = vsel %vm2862_vm3, 0.0, %v1584_v38  ;;  %v1608_v63 = vpack.c.bf16 %v3514_v62, %v3514_v62  ;;  %vm3941_vm6 = vmmov %vm3932_vm1 }
 0x27d   : > { %vm1529_vm7 = vweird.f32 %v3363_v19  ;;  %v3537_v2 = vmul.f32 %v1522_v49, %v3358_v3  ;;  %v1582_v7 = vsel %vm3936_vm10, %v1576_v8, %v1577_v32  ;;  %v1583_v60 = vsel %vm3937_vm5, %v1575_v26, %v1576_v8 }
 0x27e   : > { %v1684_v54 = vpack.c.b16 %v1677_v5, %v1676_v9  ;;  %v1614_v50 = vpack.c.bf16 %v1590_v17, %v1590_v17  ;;  %vm3939_vm2 = vnez %v3852_v36  ;;  %vm3940_vm3 = vnez %v3846_v15 }
 0x27f   : > { %v1592_v55 = vsel %vm3939_vm2, 0.0, %v1582_v7  ;;  %v1591_v6 = vsel %vm3940_vm3, 0.0, %v1583_v60  ;;  %v1609_v12 = vpack.c.bf16 %v3517_v43, %v3517_v43  ;;  %v1652_v3 = vunpack.c.l.b16 %v1608_v63 }
 0x280   : > { %1688 = vrot.lane.b32.xlu0 %v1684_v54, %s3938_s26  ;;  %v1578_v33 = vrot.slane %v3537_v2, 1  ;;  %v1616_v20 = vpack.c.bf16 %v1592_v55, %v1592_v55  ;;  %v1615_v25 = vpack.c.bf16 %v1591_v6, %v1591_v6  ;;  %v1678_v48 = vunpack.c.l.b16 %v1614_v50 }
 0x281   : > { %v1653_v58 = vunpack.c.l.b16 %v1609_v12  ;;  %v1526_v34 = vsub.f32 1.0, %v1525_v23  ;;  %vm1530_vm14 = vweird.f32 %v3398_v39  ;;  %v1535_v56 = vand.u32 2147483648, %v3363_v19 }
 0x282   : > { %v1581_v36 = vsel %vm3941_vm6, %v1577_v32, %v1578_v33  ;;  %v1680_v15 = vunpack.c.l.b16 %v1616_v20  ;;  %v1679_v31 = vunpack.c.l.b16 %v1615_v25  ;;  %v3942_v27 = vand.u32 2147483647, %v3363_v19  ;;  %vm1531_vm0 = vmor %vm1529_vm7, %vm1530_vm14 }
 0x283   : > { %vm3945_vm15 = vnez %v3856_v57  ;;  %v1658_v37 = vpack.c.b16 %v1653_v58, %v1652_v3  ;;  %v1527_v18 = vmul.f32 %v3398_v39, %v1526_v34  ;;  %v1610_v42 = vpack.c.bf16 %v3537_v2, %v3537_v2  ;;  %vm3957_vm14 = vmmov %vm3941_vm6 }
 0x284   : > { %vm3557_vm8 = vcmp.eq.f32.partialorder %v3942_v27, 8.507059e+37  ;;  %v1593_v16 = vsel %vm3945_vm15, 0.0, %v1581_v36  ;;  %v1685_v45 = vpack.c.b16 %v1679_v31, %v1678_v48  ;;  %v1536_v10 = vor.u32 1.1754944e-38, %v1535_v56 }
 0x285   : > { %v1617_v28 = vpack.c.bf16 %v1593_v16, %v1593_v16  ;;  %v1549_v22 = vrot.slane %v3479_v41, 7  ;;  %v1528_v52 = vadd.f32 %v3398_v39, %v1527_v18  ;;  %v1548_v26 = vrot.slane %v3475_v46, 7 }
 0x286   : > { %v1553_v9 = vrot.slane %v3517_v43, 7  ;;  %v1554_v57 = vrot.slane %v3537_v2, 7  ;;  %1690 = vrot.lane.b32.xlu2 %v1685_v45, %s3938_s26  ;;  %v1551_v29 = vrot.slane %v3454_v40, 7  ;;  %v1550_v41 = vrot.slane %v3451_v14, 7 }
 0x287   : > { %v1681_v5 = vunpack.c.l.b16 %v1617_v28  ;;  %v1552_v23 = vrot.slane %v3514_v62, 7  ;;  %v1532_v43 = vsel %vm1531_vm0, %v3398_v39, %v1528_v52  ;;  %v1654_v61 = vunpack.c.l.b16 %v1610_v42  ;;  %v2379_v52 = vld [vmem:[%s3801_s8 + $0x58] sm:$0xff] }
 0x288   : > { %1664 = vrot.lane.b32.xlu0 %v1658_v37, %s2600_s20  ;;  %vm3946_vm12 = vcmp.lt.s32.totalorder %v2771_v51, 1  ;;  %v1537_v19 = vsel %vm3557_vm8, %v1536_v10, %v1532_v43  ;;  %vm3948_vm11 = vnez %v3892_v21  ;;  %vm3949_vm13 = vnez %v3886_v13  ;;  %1880 = vmatpush.bf16.msrb.mxu0 %v2379_v52  ;;  %v2376_v43 = vld [vmem:[%s3801_s8 + $0x40] sm:$0xff]  ;;  %v2528_v52 = vld [vmem:[%s2716_s29 + $0x8] sm:$0xff] }
 0x289   : > { %v1562_v8 = vsel %vm3946_vm12, %v1548_v26, %v1549_v22  ;;  %vm3947_vm1 = vmmov %vm3946_vm12  ;;  %v1686_v38 = vpack.c.b16 %v1681_v5, %v1680_v15  ;;  %v1546_v62 = vmul.f32 %v1537_v19, %v3339_v4  ;;  %vm3952_vm7 = vnez %v3878_v53  ;;  %v2383_v5 = vld [vmem:[%s3801_s8 + $0x18] sm:$0xff]  ;;  %v2374_v19 = vld [vmem:[%s3801_s8 + $0x30] sm:$0xff] }
 0x28a   : > { %v1557_v32 = vsel %vm3947_vm1, %v1553_v9, %v1554_v57  ;;  %v1565_v14 = vsel %vm3948_vm11, 0.0, %v1562_v8  ;;  %vm3950_vm9 = vmmov %vm3947_vm1  ;;  %vm3955_vm2 = vnez %v3880_v35  ;;  %vm3956_vm3 = vnez %v3882_v1  ;;  %v2375_v8 = vld [vmem:[%s3801_s8 + $0x38] sm:$0xff] }
 0x28b   : > { %v1570_v40 = vsel %vm3949_vm13, 0.0, %v1557_v32  ;;  %v1597_v39 = vpack.c.bf16 %v1565_v14, %v1565_v14  ;;  %v1560_v49 = vsel %vm3950_vm9, %v1550_v41, %v1551_v29  ;;  %1692 = vrot.lane.b32.xlu1 %v1686_v38, %s3938_s26  ;;  %vm3951_vm4 = vmmov %vm3947_vm1  ;;  %v1611_v4 = vpack.c.bf16 %v1546_v62, %v1546_v62  ;;  %v2381_v32 = vld [vmem:[%s3801_s8 + $0x8] sm:$0xff]  ;;  %v2388_v38 = vld [vmem:[%s3801_s8 + $0x70] sm:$0xff] }
 0x28c   : > { %v1602_v54 = vpack.c.bf16 %v1570_v40, %v1570_v40  ;;  %v1561_v17 = vsel %vm3951_vm4, %v1549_v22, %v1550_v41  ;;  %v1567_v63 = vsel %vm3952_vm7, 0.0, %v1560_v49  ;;  %vm3953_vm10 = vmmov %vm3947_vm1  ;;  %v1579_v2 = vrot.slane %v1546_v62, 1  ;;  %v2385_v22 = vld [vmem:[%s3801_s8 + $0x28] sm:$0xff]  ;;  %v2390_v41 = vld [vmem:[%s3801_s8 + $0x80] sm:$0xff] }
 0x28d   : > { %v1558_v21 = vsel %vm3953_vm10, %v1552_v23, %v1553_v9  ;;  %vm3954_vm5 = vmmov %vm3947_vm1  ;;  %v1555_v7 = vrot.slane %v1546_v62, 7  ;;  %v3603_v60 = vunpack.c.l.b16 %v1597_v39  ;;  %v1566_v55 = vsel %vm3955_vm2, 0.0, %v1561_v17  ;;  %1807 = vmatpush.bf16.msrb.mxu3 %v2385_v22  ;;  %v2391_v9 = vld [vmem:[%s3801_s8 + $0x88] sm:$0xff]  ;;  %v2380_v40 = vld [vmem:[%s3801_s8] sm:$0xff] }
 0x28e   : > { %v1559_v13 = vsel %vm3954_vm5, %v1551_v29, %v1552_v23  ;;  %v3605_v50 = vunpack.c.l.b16 %v1602_v54  ;;  %v1599_v6 = vpack.c.bf16 %v1567_v63, %v1567_v63  ;;  %v1655_v12 = vunpack.c.l.b16 %v1611_v4  ;;  %vm3958_vm8 = vmmov %vm3947_vm1  ;;  %1962 = vmatpush.bf16.msrb.mxu1 %v2391_v9  ;;  %v2377_v29 = vld [vmem:[%s3801_s8 + $0x48] sm:$0xff]  ;;  %v2382_v23 = vld [vmem:[%s3801_s8 + $0x10] sm:$0xff] }
 0x28f   : > { %v1568_v53 = vsel %vm3956_vm3, 0.0, %v1559_v13  ;;  %v1580_v3 = vsel %vm3957_vm14, %v1578_v33, %v1579_v2  ;;  %v1587_v20 = vsel %vm3941_vm6, %v1579_v2, %v1572_v47  ;;  %v1563_v25 = vsel %vm3958_vm8, %v1555_v7, %v1548_v26  ;;  %v2384_v26 = vld [vmem:[%s3801_s8 + $0x20] sm:$0xff]  ;;  %v2387_v14 = vld [vmem:[%s3801_s8 + $0x68] sm:$0xff] }
 0x290   : > { %vm3959_vm15 = vnez %v3872_v30  ;;  %vm3960_vm0 = vnez %v3874_v59  ;;  %vm3961_vm12 = vnez %v3890_v44  ;;  %v1556_v33 = vsel %vm3947_vm1, %v1554_v57, %v1555_v7  ;;  %v2378_v57 = vld [vmem:[%s3801_s8 + $0x50] sm:$0xff]  ;;  %v2386_v62 = vld [vmem:[%s3801_s8 + $0x60] sm:$0xff] }
 0x291   : > { %v1594_v35 = vsel %vm3959_vm15, 0.0, %v1580_v3  ;;  %v1595_v48 = vsel %vm3960_vm0, 0.0, %v1587_v20  ;;  %v1564_v1 = vsel %vm3961_vm12, 0.0, %v1563_v25  ;;  %v1659_v58 = vpack.c.b16 %v1655_v12, %v1654_v61  ;;  %1808 = vmatpush.bf16.msrb.mxu3 %v2384_v26  ;;  %1881 = vmatpush.bf16.msrb.mxu0 %v2378_v57  ;;  %v2389_v61 = vld [vmem:[%s3801_s8 + $0x78] sm:$0xff] }
 0x292   : > { %v1618_v46 = vpack.c.bf16 %v1594_v35, %v1594_v35  ;;  %v1619_v34 = vpack.c.bf16 %v1595_v48, %v1595_v48  ;;  %v1596_v56 = vpack.c.bf16 %v1564_v1, %v1564_v1  ;;  %vm3962_vm11 = vnez %v3888_v0  ;;  %1963 = vmatpush.bf16.msrb.mxu1 %v2390_v41 }
 0x293   : > { %v1571_v47 = vsel %vm3962_vm11, 0.0, %v1556_v33  ;;  %v1598_v36 = vpack.c.bf16 %v1566_v55, %v1566_v55  ;;  %v1631_v15 = vunpack.c.l.b16 %v1599_v6  ;;  %vm3963_vm13 = vnez %v3884_v11  ;;  %1666 = vrot.lane.b32.xlu2 %v1659_v58, %s2600_s20  ;;  %v3969_v55 = vld [vmem:[#allocation5_spill] sm:$0xff] }
 0x294   : > { %v1569_v30 = vsel %vm3963_vm13, 0.0, %v1558_v21  ;;  %v1682_v59 = vunpack.c.l.b16 %v1618_v46  ;;  %v1683_v44 = vunpack.c.l.b16 %v1619_v34  ;;  %v1628_v31 = vunpack.c.l.b16 %v1596_v56 }
 0x295   : > { %v1603_v27 = vpack.c.bf16 %v1571_v47, %v1571_v47  ;;  %v1630_v51 = vunpack.c.l.b16 %v1598_v36  ;;  %v1600_v24 = vpack.c.bf16 %v1568_v53, %v1568_v53  ;;  %v1601_v16 = vpack.c.bf16 %v1569_v30, %v1569_v30  ;;  %1809 = vmatpush.bf16.msrb.mxu3 %v2383_v5  ;;  %1882 = vmatpush.bf16.msrb.mxu0 %v2377_v29 }
 0x296   : > { %v1687_v37 = vpack.c.b16 %v1683_v44, %v1682_v59  ;;  %v1636_v18 = vpack.c.b16 %v3603_v60, %v1628_v31  ;;  %1964 = vmatpush.bf16.msrb.mxu1 %v2389_v61  ;;  %vm3964_vm9 = vcmask 261120   ;;  %vm3965_vm4 = vcmask 523264  }
 0x297   : > { %v3633_v42 = vunpack.c.l.b16 %v1603_v27  ;;  %v1637_v0 = vpack.c.b16 %v1631_v15, %v1630_v51  ;;  %v1632_v28 = vunpack.c.l.b16 %v1600_v24  ;;  %v1633_v45 = vunpack.c.l.b16 %v1601_v16  ;;  %vm3966_vm7 = vmmov %vm3964_vm9  ;;  %v3721_v51 = vld [vmem:[%s3802_s9] ss:$0 sm:$0xff] }
 0x298   : > { %1694 = vrot.lane.b32.xlu0 %v1687_v37, %s3938_s26  ;;  %vm3967_vm10 = vmmov %vm3965_vm4  ;;  %vm3968_vm5 = vcmask 785408   ;;  %s2115_s26 = sshll.u32 %s361_s11, 6 }
 0x299   : > { %v1639_v11 = vpack.c.b16 %v3633_v42, %v3605_v50  ;;  %v1638_v10 = vpack.c.b16 %v1633_v45, %v1632_v28  ;;  %1810 = vmatpush.bf16.msrb.mxu3 %v2382_v23  ;;  %1883 = vmatpush.bf16.msrb.mxu0 %v2376_v43  ;;  %vm3970_vm2 = vmmov %vm3968_vm5  ;;  %v2527_v42 = vld [vmem:[%s2716_s29] sm:$0xff]  ;;  %s3727_s20 = scalar_lea.vmem [#allocation2], %s2115_s26  ;;  %v2529_v43 = vld [vmem:[%s2716_s29 + $0x10] sm:$0xff]  ;;  %s2551_s26 = scalar_lea.hbm %s2550_s18, 64 }
 0x29a   : > { %1965 = vmatpush.bf16.msrb.mxu1 %v2388_v38  ;;  %vm3971_vm3 = vmmov %vm3970_vm2  ;;  %s2037_s25 = sshll.u32 %s3727_s20, 4  ;;  %p2552_p11 = scmp.ne.s32.totalorder %s2550_s18, %s2551_s26  ;;  %s2038_s25 = int_to_ptr.vmem [resolvable:$true] %s2037_s25 }
 0x29b   : > { %vm3972_vm14 = vmmov %vm3966_vm7  ;;  %p2557_p1 = scmp.lt.s32.totalorder %s2555_s30, %s2551_s26 }
 0x29c   : > { %vm3973_vm6 = vmmov %vm3965_vm4  ;;  %p2553_p12 = pnand %p2552_p11, %p2698_p5 }
 0x29d   : > { %1884 = vmatpush.bf16.msrb.mxu0 %v2375_v8  ;;  %1811 = vmatpush.bf16.msrb.mxu3 %v2381_v32  ;;  %vm3974_vm8 = vmmov %vm3970_vm2  ;;  %p2558_p2 = por %p2557_p1, %p2556_p0 }
 0x29e   : > { %1966 = vmatpush.bf16.msrb.mxu1 %v2387_v14  ;;  %vm3975_vm15 = vmmov %vm3966_vm7  ;;  %p2554_p13 = pneg %p2553_p12 }
 0x29f   : > { %vm3976_vm0 = vmmov %vm3970_vm2 }
 0x2a0   : > { %vm3977_vm12 = vmmov %vm3976_vm0  ;;  %p2559_p3 = pnand %p2558_p2, %p2554_p13 }
 0x2a1   : > { %1885 = vmatpush.bf16.msrb.mxu0 %v2374_v19  ;;  %1812 = vmatpush.bf16.msrb.mxu3 %v2380_v40  ;;  %vm3978_vm1 = vmmov %vm3965_vm4 }
 0x2a2   : > { %1967 = vmatpush.bf16.msrb.mxu1 %v2386_v62  ;;  %vm3979_vm11 = vmmov %vm3976_vm0  ;;  %v2530_v62 = vld [vmem:[%s2716_s29 + $0x18] sm:$0xff] }
 0x2a3   : > { %vm3980_vm13 = vmmov %vm3976_vm0 }
 0x2d4   : > { %v1661_v39 = vpop.permute.xlu2 %1660 }
 0x2d5   : > { %v1698_v21 = vsel %vm3966_vm7, %v1636_v18, %v1661_v39  ;;  %vm3983_vm7 = vmmov %vm3976_vm0 }
 0x2e0   : > { %v1691_v17 = vpop.permute.xlu2 %1690 }
 0x2e8   : > { %v1663_v54 = vpop.permute.xlu1 %1662 }
 0x2e9   : > { %v1701_v49 = vsel %vm3964_vm9, %v1637_v0, %v1663_v54  ;;  %vm3981_vm9 = vmmov %vm3976_vm0 }
 0x2ea   : > { %v1711_v63 = vsel %vm3965_vm4, %v1701_v49, %v1691_v17  ;;  %vm3982_vm4 = vmmov %vm3976_vm0 }
 0x2eb   : > { %v1735_v2 = vunpack.c.l.b16 %v1711_v63  ;;  %v1736_v35 = vunpack.c.h.b16 %v1711_v63 }
 0x2ed   : > { %v1667_v33 = vpop.permute.xlu2 %1666 }
 0x2ee   : > { %v1707_v58 = vsel %vm3975_vm15, %v1639_v11, %v1667_v33  ;;  %v2533_v33 = vld [vmem:[%s2716_s29 + $0x30] sm:$0xff] }
 0x2f2   : > { %v1689_v13 = vpop.permute.xlu0 %1688 }
 0x2f3   : > { %v1709_v4 = vsel %vm3967_vm10, %v1698_v21, %v1689_v13  ;;  %vm3984_vm10 = vmmov %vm3976_vm0 }
 0x2f4   : > { %v1733_v7 = vunpack.c.l.b16 %v1709_v4  ;;  %v1734_v60 = vunpack.c.h.b16 %v1709_v4  ;;  %2306 = vmatmul.msk.bf16.vlgmr.msrb.gmra.mxu0 %vm3968_vm5, %v1709_v4  ;;  %vm3985_vm5 = vmmov %vm3972_vm14  ;;  %v2531_v4 = vld [vmem:[%s2716_s29 + $0x20] sm:$0xff] }
 0x2f6   : > { %v1753_v6 = vpack.c.b16 %v1733_v7, %v3969_v55  ;;  %v1754_v53 = vpack.c.b16 %v1735_v2, %v1734_v60 }
 0x2f8   : > { %2278 = vmatmul.msk.bf16.vlgmr.msrb.gmra.mxu3 %vm3970_vm2, %v1753_v6  ;;  %2346 = vmatmul.msk.bf16.vlgmr.msrb.gmra.mxu1 %vm3971_vm3, %v1754_v53  ;;  %vm3986_vm2 = vmmov %vm3985_vm5 }
 0x2f9   : > { %vm3987_vm3 = vmmov %vm3986_vm2 }
 0x2fa   : > { %v1665_v12 = vpop.permute.xlu0 %1664  ;;  %vm3991_vm15 = vmmov %vm3986_vm2 }
 0x2fb   : > { %v1704_v3 = vsel %vm3972_vm14, %v1638_v10, %v1665_v12  ;;  %vm3988_vm14 = vmmov %vm3986_vm2  ;;  %v2532_v12 = vld [vmem:[%s2716_s29 + $0x28] sm:$0xff] }
 0x2fd   : > { %v1693_v20 = vpop.permute.xlu1 %1692 }
 0x2fe   : > { %v1713_v25 = vsel %vm3973_vm6, %v1704_v3, %v1693_v20  ;;  %vm3989_vm6 = vmmov %vm3986_vm2 }
 0x2ff   : > { %v1737_v48 = vunpack.c.l.b16 %v1713_v25  ;;  %v1738_v47 = vunpack.c.h.b16 %v1713_v25 }
 0x301   : > { %v1755_v1 = vpack.c.b16 %v1737_v48, %v1736_v35 }
 0x304   : > { %2307 = vmatmul.msk.bf16.gmra.mxu0 %vm3974_vm8, %v1711_v63  ;;  %vm3990_vm8 = vmmov %vm3986_vm2 }
 0x308   : > { %2279 = vmatmul.msk.bf16.gmra.mxu3 %vm3976_vm0, %v1754_v53  ;;  %2347 = vmatmul.msk.bf16.gmra.mxu1 %vm3977_vm12, %v1755_v1  ;;  %vm3992_vm0 = vmmov %vm3986_vm2 }
 0x30a   : > { %v1695_v46 = vpop.permute.xlu0 %1694 }
 0x30b   : > { %v1715_v34 = vsel %vm3978_vm1, %v1707_v58, %v1695_v46 }
 0x30c   : > { %v1739_v56 = vunpack.c.l.b16 %v1715_v34  ;;  %v1740_v50 = vunpack.c.h.b16 %v1715_v34 }
 0x30e   : > { %v1756_v36 = vpack.c.b16 %v1739_v56, %v1738_v47  ;;  %v1920_v15 = vpack.c.b16 %v3969_v55, %v1740_v50 }
 0x314   : > { %2308 = vmatmul.msk.bf16.gmra.mxu0 %vm3979_vm11, %v1713_v25 }
 0x318   : > { %2280 = vmatmul.msk.bf16.gmra.mxu3 %vm3980_vm13, %v1755_v1  ;;  %2348 = vmatmul.msk.bf16.gmra.mxu1 %vm3981_vm9, %v1756_v36 }
 0x324   : > { %2309 = vmatmul.msk.bf16.gmra.mxu0 %vm3982_vm4, %v1715_v34 }
 0x328   : > { %2281 = vmatmul.msk.bf16.gmra.mxu3 %vm3983_vm7, %v1756_v36  ;;  %2349 = vmatmul.msk.bf16.gmra.mxu1 %vm3984_vm10, %v1920_v15  ;;  %v2534_v15 = vld [vmem:[%s2716_s29 + $0x38] sm:$0xff] }
 0x371   : > { %v1887_v30 = vpop.f32.mrf.mxu0 }
 0x375   : > { %v1969_v59 = vpop.f32.mrf.mxu1 }
 0x379   : > { %v1889_v44 = vpop.f32.mrf.mxu0 }
 0x37b   : > { %v1814_v31 = vpop.f32.mrf.mxu3 }
 0x37c   : > { %v1888_v27 = vadd.f32 %v1887_v30, %v1814_v31 }
 0x37d   : > { %v1971_v24 = vpop.f32.mrf.mxu1 }
 0x37e   : > { %v1989_v16 = vadd.f32 %v1969_v59, %v1888_v27 }
 0x380   : > { %v2000_v37 = vadd.f32 %v3721_v51, %v1989_v16 }
 0x381   : > { %v1892_v18 = vpop.f32.mrf.mxu0 }
 0x382   : > { %v2008_v0 = vadd.f32 %v2527_v42, %v2000_v37 }
 0x383   : > { %v1816_v28 = vpop.f32.mrf.mxu3 }
 0x384   : > { %2016 = vst.msk [vmem:[%s3727_s20] sm:$0xff] %vm3985_vm5, %v2008_v0  ;;  %v1890_v45 = vadd.f32 %v1889_v44, %v1816_v28 }
 0x385   : > { %v1974_v11 = vpop.f32.mrf.mxu1 }
 0x386   : > { %v1990_v10 = vadd.f32 %v1971_v24, %v1890_v45 }
 0x388   : > { %v2001_v22 = vadd.f32 %v3721_v51, %v1990_v10 }
 0x389   : > { %v1894_v9 = vpop.f32.mrf.mxu0 }
 0x38a   : > { %v2009_v26 = vadd.f32 %v2528_v52, %v2001_v22 }
 0x38b   : > { %v1819_v57 = vpop.f32.mrf.mxu3 }
 0x38c   : > { %2017 = vst.msk [vmem:[%s3727_s20 + $0x8] sm:$0xff] %vm3986_vm2, %v2009_v26  ;;  %v1893_v5 = vadd.f32 %v1892_v18, %v1819_v57 }
 0x38d   : > { %v1976_v29 = vpop.f32.mrf.mxu1 }
 0x38e   : > { %v1991_v41 = vadd.f32 %v1974_v11, %v1893_v5 }
 0x390   : > { %v2002_v23 = vadd.f32 %v3721_v51, %v1991_v41 }
 0x391   : > { %v1897_v38 = vpop.f32.mrf.mxu0 }
 0x392   : > { %v2010_v61 = vadd.f32 %v2529_v43, %v2002_v23 }
 0x393   : > { %v1821_v8 = vpop.f32.mrf.mxu3 }
 0x394   : > { %2018 = vst.msk [vmem:[%s3727_s20 + $0x10] sm:$0xff] %vm3987_vm3, %v2010_v61  ;;  %v1895_v32 = vadd.f32 %v1894_v9, %v1821_v8 }
 0x395   : > { %v1979_v14 = vpop.f32.mrf.mxu1 }
 0x396   : > { %v1992_v19 = vadd.f32 %v1976_v29, %v1895_v32 }
 0x398   : > { %v2003_v40 = vadd.f32 %v3721_v51, %v1992_v19 }
 0x399   : > { %v1899_v63 = vpop.f32.mrf.mxu0 }
 0x39a   : > { %v2011_v39 = vadd.f32 %v2530_v62, %v2003_v40 }
 0x39b   : > { %v1824_v54 = vpop.f32.mrf.mxu3 }
 0x39c   : > { %2019 = vst.msk [vmem:[%s3727_s20 + $0x18] sm:$0xff] %vm3988_vm14, %v2011_v39  ;;  %v1898_v49 = vadd.f32 %v1897_v38, %v1824_v54 }
 0x39d   : > { %v1981_v13 = vpop.f32.mrf.mxu1 }
 0x39e   : > { %v1993_v17 = vadd.f32 %v1979_v14, %v1898_v49 }
 0x3a0   : > { %v2004_v21 = vadd.f32 %v3721_v51, %v1993_v17 }
 0x3a1   : > { %v1902_v53 = vpop.f32.mrf.mxu0 }
 0x3a2   : > { %v2012_v2 = vadd.f32 %v2531_v4, %v2004_v21 }
 0x3a3   : > { %v1826_v7 = vpop.f32.mrf.mxu3 }
 0x3a4   : > { %2020 = vst.msk [vmem:[%s3727_s20 + $0x20] sm:$0xff] %vm3989_vm6, %v2012_v2  ;;  %v1900_v60 = vadd.f32 %v1899_v63, %v1826_v7 }
 0x3a5   : > { %v1984_v20 = vpop.f32.mrf.mxu1 }
 0x3a6   : > { %v1994_v55 = vadd.f32 %v1981_v13, %v1900_v60 }
 0x3a8   : > { %v2005_v6 = vadd.f32 %v3721_v51, %v1994_v55 }
 0x3a9   : > { %v1904_v46 = vpop.f32.mrf.mxu0 }
 0x3aa   : > { %v2013_v3 = vadd.f32 %v2532_v12, %v2005_v6 }
 0x3ab   : > { %v1829_v25 = vpop.f32.mrf.mxu3 }
 0x3ac   : > { %2021 = vst.msk [vmem:[%s3727_s20 + $0x28] sm:$0xff] %vm3990_vm8, %v2013_v3  ;;  %v1903_v35 = vadd.f32 %v1902_v53, %v1829_v25 }
 0x3ad   : > { %v1986_v47 = vpop.f32.mrf.mxu1 }
 0x3ae   : > { %v1995_v48 = vadd.f32 %v1984_v20, %v1903_v35 }
 0x3b0   : > { %v2006_v1 = vadd.f32 %v3721_v51, %v1995_v48 }
 0x3b2   : > { %v2014_v58 = vadd.f32 %v2533_v33, %v2006_v1 }
 0x3b3   : > { %v1831_v34 = vpop.f32.mrf.mxu3 }
 0x3b4   : > { %2022 = vst.msk [vmem:[%s3727_s20 + $0x30] sm:$0xff] %vm3991_vm15, %v2014_v58  ;;  %v1905_v56 = vadd.f32 %v1904_v46, %v1831_v34 }
 0x3b6   : > { %v1996_v36 = vadd.f32 %v1986_v47, %v1905_v56 }
 0x3b8   : > { %v2007_v50 = vadd.f32 %v3721_v51, %v1996_v36 }
 0x3ba   : > { %v2015_v30 = vadd.f32 %v2534_v15, %v2007_v50 }
 0x3bc   : > { %2023 = vst.msk [vmem:[%s3727_s20 + $0x38] sm:$0xff] %vm3992_vm0, %v2015_v30 }
 0x3bd   : > { %2562 = shalt.err (!%p2559_p3)
}
 0x3be   : > { %s2603_s29 = smov 128   ;;  %s2604_s11 = smov 8  }
 0x3bf   : > { %2405 = dma.vmem_to_hbm [thread:$0]  (%p2698_p5), %s2038_s25, 1024, %s2040_s12, %s2025_s17, %s2603_s29, %s2603_s29, %s2604_s11  }
 0x3c0 PF: > { %p2411_p4 = scmp.ge.s32.totalorder %s2597_s16, 2  ;;  %s2054_s20 = sand.u32 1, %s2585_s13  }
 0x3c1   : > { %s2055_s0 = scalar_lea.sflag [#allocation3], %s2054_s20 }
 0x3c2   : > { %p2408_p7 = pnand %p2411_p4, %p2702_p6 }
 0x3c4   : > { %p2409_p8 = pneg %p2408_p7 }
 0x3c6   : > { %2580 = dma.done.wait (%p2409_p8), %s2055_s0, 1024  }
 0x3c7   : > { %2582 = vsyncadd (%p2409_p8), %s2055_s0, 4294966272  ;;  %p20_p9 = scmp.ge.s32.totalorder %s2685_s19, 4   ;;  %s3993_s13 = smov %s2589_s14 }
 0x3c8   : > { %s3994_s14 = smov %s2593_s15  ;;  %s3995_s15 = smov %s2696_s22 }
 0x3c9   : > { %s3996_s16 = smov %s2685_s19  ;;  %22 = sbr.rel (!%p20_p9) target bundleno = 5 (0x5), region = 102 }
 0x3ce   :  { %2061 = vsyncpa [#allocation3], 1 }
 0x3cf   :  { %2063 = vsyncpa [#allocation3 + $0x1], 1 }

</bundles_post_ra>
